<compile_context>
chip_gen: v6e
topology: v6e:2x2x1
jax: 0.10.0
libtpu: 0.0.40
codegen_flags: <defaults>
</compile_context>

<pallas_src>
import jax
import jax.numpy as jnp
from jax.experimental import pallas as pl
from jax.experimental.pallas import tpu as pltpu  # noqa: F401  (kept for TPU-specific tuning hooks)

P_DROP = 0.25


def attn_dropout_kernel(q_ref, k_ref, v_ref, mask_ref, o_ref):
    """Whole-problem kernel: all refs are full (B, ...) arrays in VMEM."""
    B = q_ref.shape[0]
    for b in range(B):  # B == 2, static unroll -> plain 2-D MXU dots
        q = q_ref[b]      # (S, D)  f32
        k = k_ref[b]      # (S, D)  f32
        v = v_ref[b]      # (S, Dv) f32

        # scaled_qk = q @ k^T  -> (S, S)   (MXU)
        qk = jnp.dot(q, k.T, preferred_element_type=jnp.float32)

        # inv_scale = 1/sqrt(sum(q^2 + k^2, -1)); qk.div(inv_scale) == qk * sqrt(s)
        s = jnp.sum(q * q + k * k, axis=-1, keepdims=True)   # (S, 1)
        scale = jnp.sqrt(s)

        # dropout: mask already holds 0.0 or 1/(1-p), so one select-free path.
        dropped = qk * scale * mask_ref[b]                    # (S, S)

        # output = dropped @ v -> (S, Dv)   (MXU)
        o_ref[b] = jnp.dot(dropped, v, preferred_element_type=jnp.float32)


def model_forward(x, query, key, value, dropout_key):
    # `x` is unused, matching the PyTorch forward().
    del x
    B, S, _ = query.shape
    Dv = value.shape[-1]

    # Pre-scaled dropout keep mask: 0.0 (dropped) or 1/(1-p) (kept).
    keep = jax.random.bernoulli(dropout_key, 1.0 - P_DROP, (B, S, S))
    mask = keep.astype(jnp.float32) * (1.0 / (1.0 - P_DROP))

    # No grid: the whole problem (<1 MiB) is a single kernel invocation with
    # full-array VMEM blocks (default BlockSpecs), which minimizes fixed
    # per-grid-step overhead on this latency-bound problem.
    return pl.pallas_call(
        attn_dropout_kernel,
        out_shape=jax.ShapeDtypeStruct((B, S, Dv), jnp.float32),
    )(query, key, value, mask)


if __name__ == "__main__":
    B, S, D, Dv = 2, 200, 10, 20

    root = jax.random.PRNGKey(0)
    kq, kk, kv, kx, kdrop = jax.random.split(root, 5)

    # Deterministic "torch.randn"-style parameter init.
    query = jax.random.normal(kq, (B, S, D), dtype=jnp.float32)
    key_p = jax.random.normal(kk, (B, S, D), dtype=jnp.float32)
    value = jax.random.normal(kv, (B, S, Dv), dtype=jnp.float32)

    # Forward input (unused by the module, kept for interface parity).
    x = jax.random.normal(kx, (2, 4, 16, 16), dtype=jnp.float32)

    out = model_forward(x, query, key_p, value, dropout_key=kdrop)
    out = jax.block_until_ready(out)

    assert out.shape == (B, S, Dv), out.shape
    assert jnp.isfinite(out).all()
    print("KERNEL_OK")
</pallas_src>

<mosaic_0001>
module attributes {stable_mosaic.version = 11 : i64} {
  func.func @attn_dropout_kernel(%arg0: memref<2x200x10xf32, #tpu.memory_space<vmem>>, %arg1: memref<2x200x10xf32, #tpu.memory_space<vmem>>, %arg2: memref<2x200x20xf32, #tpu.memory_space<vmem>>, %arg3: memref<2x200x200xf32, #tpu.memory_space<vmem>>, %arg4: memref<2x200x20xf32, #tpu.memory_space<vmem>>) attributes {dimension_semantics = [], scalar_prefetch = 0 : i64, scratch_operands = 0 : i64, tpu.core_type = #tpu.core_type<tc>} {
    %c0 = arith.constant 0 : index
    %c0_0 = arith.constant 0 : index
    %c0_1 = arith.constant 0 : index
    %0 = vector.load %arg0[%c0, %c0_0, %c0_1] : memref<2x200x10xf32, #tpu.memory_space<vmem>>, vector<1x200x10xf32>
    %1 = vector.shape_cast %0 : vector<1x200x10xf32> to vector<200x10xf32>
    %c0_2 = arith.constant 0 : index
    %c0_3 = arith.constant 0 : index
    %c0_4 = arith.constant 0 : index
    %2 = vector.load %arg1[%c0_2, %c0_3, %c0_4] : memref<2x200x10xf32, #tpu.memory_space<vmem>>, vector<1x200x10xf32>
    %3 = vector.shape_cast %2 : vector<1x200x10xf32> to vector<200x10xf32>
    %c0_5 = arith.constant 0 : index
    %c0_6 = arith.constant 0 : index
    %c0_7 = arith.constant 0 : index
    %4 = vector.load %arg2[%c0_5, %c0_6, %c0_7] : memref<2x200x20xf32, #tpu.memory_space<vmem>>, vector<1x200x20xf32>
    %5 = vector.shape_cast %4 : vector<1x200x20xf32> to vector<200x20xf32>
    %6 = tpu.transpose %3, [1, 0] : vector<200x10xf32> -> vector<10x200xf32>
    %cst = arith.constant dense<0.000000e+00> : vector<200x200xf32>
    %7 = tpu.matmul %1, %6, %cst {dimension_numbers = #tpu.dot_dimension_numbers<[1], [0], [0], [1], [0, 0, 1, 1], [], []>} : vector<200x10xf32>, vector<10x200xf32>, vector<200x200xf32> -> vector<200x200xf32>
    %8 = arith.mulf %1, %1 : vector<200x10xf32>
    %9 = arith.mulf %3, %3 : vector<200x10xf32>
    %10 = arith.addf %8, %9 : vector<200x10xf32>
    %cst_8 = arith.constant dense<0.000000e+00> : vector<200xf32>
    %11 = vector.multi_reduction <add>, %10, %cst_8 [1] : vector<200x10xf32> to vector<200xf32>
    %12 = vector.shape_cast %11 : vector<200xf32> to vector<200x1xf32>
    %13 = math.sqrt %12 : vector<200x1xf32>
    %14 = vector.broadcast %13 : vector<200x1xf32> to vector<200x200xf32>
    %15 = arith.mulf %7, %14 : vector<200x200xf32>
    %c0_9 = arith.constant 0 : index
    %c0_10 = arith.constant 0 : index
    %c0_11 = arith.constant 0 : index
    %16 = vector.load %arg3[%c0_9, %c0_10, %c0_11] : memref<2x200x200xf32, #tpu.memory_space<vmem>>, vector<1x200x200xf32>
    %17 = vector.shape_cast %16 : vector<1x200x200xf32> to vector<200x200xf32>
    %18 = arith.mulf %15, %17 : vector<200x200xf32>
    %cst_12 = arith.constant dense<0.000000e+00> : vector<200x20xf32>
    %19 = tpu.matmul %18, %5, %cst_12 {dimension_numbers = #tpu.dot_dimension_numbers<[1], [0], [0], [1], [0, 0, 1, 1], [], []>} : vector<200x200xf32>, vector<200x20xf32>, vector<200x20xf32> -> vector<200x20xf32>
    %c0_13 = arith.constant 0 : index
    %c0_14 = arith.constant 0 : index
    %c0_15 = arith.constant 0 : index
    %20 = vector.load %arg4[%c0_13, %c0_14, %c0_15] : memref<2x200x20xf32, #tpu.memory_space<vmem>>, vector<1x200x20xf32>
    %21 = vector.shape_cast %20 : vector<1x200x20xf32> to vector<200x20xf32>
    %22 = vector.shape_cast %19 : vector<200x20xf32> to vector<1x200x20xf32>
    tpu.vector_store %arg4[%c0_13, %c0_14, %c0_15], %22 {strides = array<i32>} : memref<2x200x20xf32, #tpu.memory_space<vmem>>, vector<1x200x20xf32>,
    %c1 = arith.constant 1 : index
    %c0_16 = arith.constant 0 : index
    %c0_17 = arith.constant 0 : index
    %23 = vector.load %arg0[%c1, %c0_16, %c0_17] : memref<2x200x10xf32, #tpu.memory_space<vmem>>, vector<1x200x10xf32>
    %24 = vector.shape_cast %23 : vector<1x200x10xf32> to vector<200x10xf32>
    %c1_18 = arith.constant 1 : index
    %c0_19 = arith.constant 0 : index
    %c0_20 = arith.constant 0 : index
    %25 = vector.load %arg1[%c1_18, %c0_19, %c0_20] : memref<2x200x10xf32, #tpu.memory_space<vmem>>, vector<1x200x10xf32>
    %26 = vector.shape_cast %25 : vector<1x200x10xf32> to vector<200x10xf32>
    %c1_21 = arith.constant 1 : index
    %c0_22 = arith.constant 0 : index
    %c0_23 = arith.constant 0 : index
    %27 = vector.load %arg2[%c1_21, %c0_22, %c0_23] : memref<2x200x20xf32, #tpu.memory_space<vmem>>, vector<1x200x20xf32>
    %28 = vector.shape_cast %27 : vector<1x200x20xf32> to vector<200x20xf32>
    %29 = tpu.transpose %26, [1, 0] : vector<200x10xf32> -> vector<10x200xf32>
    %cst_24 = arith.constant dense<0.000000e+00> : vector<200x200xf32>
    %30 = tpu.matmul %24, %29, %cst_24 {dimension_numbers = #tpu.dot_dimension_numbers<[1], [0], [0], [1], [0, 0, 1, 1], [], []>} : vector<200x10xf32>, vector<10x200xf32>, vector<200x200xf32> -> vector<200x200xf32>
    %31 = arith.mulf %24, %24 : vector<200x10xf32>
    %32 = arith.mulf %26, %26 : vector<200x10xf32>
    %33 = arith.addf %31, %32 : vector<200x10xf32>
    %cst_25 = arith.constant dense<0.000000e+00> : vector<200xf32>
    %34 = vector.multi_reduction <add>, %33, %cst_25 [1] : vector<200x10xf32> to vector<200xf32>
    %35 = vector.shape_cast %34 : vector<200xf32> to vector<200x1xf32>
    %36 = math.sqrt %35 : vector<200x1xf32>
    %37 = vector.broadcast %36 : vector<200x1xf32> to vector<200x200xf32>
    %38 = arith.mulf %30, %37 : vector<200x200xf32>
    %c1_26 = arith.constant 1 : index
    %c0_27 = arith.constant 0 : index
    %c0_28 = arith.constant 0 : index
    %39 = vector.load %arg3[%c1_26, %c0_27, %c0_28] : memref<2x200x200xf32, #tpu.memory_space<vmem>>, vector<1x200x200xf32>
    %40 = vector.shape_cast %39 : vector<1x200x200xf32> to vector<200x200xf32>
    %41 = arith.mulf %38, %40 : vector<200x200xf32>
    %cst_29 = arith.constant dense<0.000000e+00> : vector<200x20xf32>
    %42 = tpu.matmul %41, %28, %cst_29 {dimension_numbers = #tpu.dot_dimension_numbers<[1], [0], [0], [1], [0, 0, 1, 1], [], []>} : vector<200x200xf32>, vector<200x20xf32>, vector<200x20xf32> -> vector<200x20xf32>
    %c1_30 = arith.constant 1 : index
    %c0_31 = arith.constant 0 : index
    %c0_32 = arith.constant 0 : index
    %43 = vector.load %arg4[%c1_30, %c0_31, %c0_32] : memref<2x200x20xf32, #tpu.memory_space<vmem>>, vector<1x200x20xf32>
    %44 = vector.shape_cast %43 : vector<1x200x20xf32> to vector<200x20xf32>
    %45 = vector.shape_cast %42 : vector<200x20xf32> to vector<1x200x20xf32>
    tpu.vector_store %arg4[%c1_30, %c0_31, %c0_32], %45 {strides = array<i32>} : memref<2x200x20xf32, #tpu.memory_space<vmem>>, vector<1x200x20xf32>,
    return
  }
}

</mosaic_0001>

<bundles_post_ra>
// kernel: tpu_custom_call.1
= control target key start
LH: loop header
LB: loop body
LE: loop exit
PB: predicated region body
PF: predicated region fallthrough
CT: control target
= control target key end

     0   :  { %vm92_vm0 = vcmask 80896   ;;  %v2896_v0 = vmov 0.0   ;;  %vm933_vm6 = vcmask 588800   ;;  %s5133_s1 = inlined_call_operand.vmem [shape: f32[2,200,10], index: 1, kind: input, shape index: {}]   ;;  %s5134_s0 = inlined_call_operand.vmem [shape: f32[2,200,10], index: 0, kind: input, shape index: {}]   ;;  %s5135_s2 = inlined_call_operand.vmem [shape: f32[2,200,20], index: 2, kind: input, shape index: {}]   ;;  %s5136_s3 = inlined_call_operand.vmem [shape: f32[2,200,200], index: 3, kind: input, shape index: {}]   ;;  %s5137_s4 = inlined_call_operand.vmem [shape: f32[2,200,20], index: 4, kind: output, shape index: {}]  }
   0x1   :  { %243 = vmatprep.subr.mxu0 %v2896_v0  ;;  %v2926_v1 = vld [vmem:[%s5133_s1 + $0x78] sm:$0xff]  ;;  %307 = vmatprep.mubr.f32.mxu0 %v2896_v0  ;;  %v2936_v2 = vld [vmem:[%s5133_s1 + $0x70] sm:$0xff]  ;;  %v2944_v3 = vld [vmem:[%s5133_s1 + $0x68] sm:$0xff] }
   0x2   :  { %2439 = vmatpush1.xpose.msk.msra.mxu0 %vm92_vm0, %v2926_v1  ;;  %1009 = vmatprep.subr.mxu1 %v2896_v0  ;;  %v2949_v4 = vld [vmem:[%s5133_s1 + $0x8] sm:$0xff]  ;;  %v2954_v5 = vld [vmem:[%s5133_s1] sm:$0xff]  ;;  %v2959_v6 = vld [vmem:[%s5133_s1 + $0x18] sm:$0xff] }
   0x3   :  { %245 = vmatprep.subr.mxu0 %v2896_v0  ;;  %v2964_v7 = vld [vmem:[%s5133_s1 + $0x10] sm:$0xff]  ;;  %v483_v8 = vmul.f32 %v2954_v5, %v2954_v5  ;;  %v484_v9 = vmul.f32 %v2949_v4, %v2949_v4  ;;  %v2973_v10 = vld [vmem:[%s5134_s0] sm:$0xff]  ;;  %v2978_v11 = vld [vmem:[%s5134_s0 + $0x8] sm:$0xff]  ;;  %v486_v13 = vmul.f32 %v2959_v6, %v2959_v6 }
   0x4   :  { %v485_v12 = vmul.f32 %v2964_v7, %v2964_v7  ;;  %v2989_v14 = vld [vmem:[%s5134_s0 + $0x10] sm:$0xff]  ;;  %v2994_v15 = vld [vmem:[%s5134_s0 + $0x18] sm:$0xff]  ;;  %v458_v16 = vmul.f32 %v2973_v10, %v2973_v10  ;;  %v459_v17 = vmul.f32 %v2978_v11, %v2978_v11  ;;  %v3004_v18 = vld [vmem:[%s5133_s1 + $0x60] sm:$0xff] }
   0x5   :  { %v3009_v19 = vld [vmem:[%s5133_s1 + $0x20] sm:$0xff]  ;;  %v460_v21 = vmul.f32 %v2989_v14, %v2989_v14  ;;  %v461_v22 = vmul.f32 %v2994_v15, %v2994_v15  ;;  %v3023_v23 = vld [vmem:[%s5133_s1 + $0x28] sm:$0xff]  ;;  %v53_v34 = vld [vmem:[%s5133_s1 + $0x58] sm:$0xff] }
   0x6   :  { %2440 = vmatpush1.xpose.msk.msra.mxu0 %vm92_vm0, %v2936_v2  ;;  %v3014_v20 = vld [vmem:[%s5134_s0 + $0x20] sm:$0xff]  ;;  %v3028_v24 = vld [vmem:[%s5134_s0 + $0x28] sm:$0xff]  ;;  %v508_v25 = vadd.f32 %v483_v8, %v458_v16  ;;  %v509_v26 = vadd.f32 %v484_v9, %v459_v17  ;;  %v487_v28 = vmul.f32 %v3009_v19, %v3009_v19  ;;  %v488_v32 = vmul.f32 %v3023_v23, %v3023_v23  ;;  %v48_v35 = vld [vmem:[%s5133_s1 + $0x30] sm:$0xff] }
   0x7   :  { %247 = vmatprep.subr.mxu0 %v2896_v0  ;;  %v462_v27 = vmul.f32 %v3014_v20, %v3014_v20  ;;  %v510_v29 = vadd.f32 %v485_v12, %v460_v21  ;;  %v511_v30 = vadd.f32 %v486_v13, %v461_v22  ;;  %v463_v31 = vmul.f32 %v3028_v24, %v3028_v24  ;;  %v3051_v36 = vld [vmem:[%s5134_s0 + $0x30] sm:$0xff]  ;;  %v49_v44 = vld [vmem:[%s5133_s1 + $0x38] sm:$0xff]  ;;  %v50_v53 = vld [vmem:[%s5133_s1 + $0x40] sm:$0xff] }
   0x8   :  { %v533_v33 = vsel %vm92_vm0, %v508_v25, 0.0  ;;  %v536_v38 = vsel %vm92_vm0, %v509_v26, 0.0  ;;  %v464_v40 = vmul.f32 %v3051_v36, %v3051_v36  ;;  %v489_v41 = vmul.f32 %v48_v35, %v48_v35  ;;  %v3065_v45 = vld [vmem:[%s5134_s0 + $0x38] sm:$0xff]  ;;  %v52_v46 = vld [vmem:[%s5133_s1 + $0x50] sm:$0xff]  ;;  %v3082_v54 = vld [vmem:[%s5134_s0 + $0x40] sm:$0xff] }
   0x9   :  { %534 = vadd.xlane.f32.xlu0 %v533_v33  ;;  %v539_v37 = vsel %vm92_vm0, %v510_v29, 0.0  ;;  %v512_v39 = vadd.f32 %v487_v28, %v462_v27  ;;  %v542_v42 = vsel %vm92_vm0, %v511_v30, 0.0  ;;  %v513_v43 = vadd.f32 %v488_v32, %v463_v31  ;;  %v51_v55 = vld [vmem:[%s5133_s1 + $0x48] sm:$0xff]  ;;  %v3106_v12 = vld [vmem:[%s5134_s0 + $0x50] sm:$0xff]  ;;  %v3116_v22 = vld [vmem:[%s5134_s0 + $0x58] sm:$0xff] }
   0xa   :  { %2441 = vmatpush1.xpose.msk.msra.mxu0 %vm92_vm0, %v2944_v3  ;;  %540 = vadd.xlane.f32.xlu1 %v539_v37  ;;  %v465_v47 = vmul.f32 %v3065_v45, %v3065_v45  ;;  %v490_v48 = vmul.f32 %v49_v44, %v49_v44  ;;  %v514_v50 = vadd.f32 %v489_v41, %v464_v40  ;;  %v3096_v61 = vld [vmem:[%s5134_s0 + $0x48] sm:$0xff]  ;;  %v3126_v29 = vld [vmem:[%s5134_s0 + $0x60] sm:$0xff] }
   0xb   :  { %249 = vmatprep.subr.mxu0 %v2896_v0  ;;  %v545_v49 = vsel %vm92_vm0, %v512_v39, 0.0  ;;  %v548_v51 = vsel %vm92_vm0, %v513_v43, 0.0  ;;  %v466_v56 = vmul.f32 %v3082_v54, %v3082_v54  ;;  %v491_v57 = vmul.f32 %v50_v53, %v50_v53 }
   0xc   :  { %v515_v52 = vadd.f32 %v490_v48, %v465_v47  ;;  %v551_v58 = vsel %vm92_vm0, %v514_v50, 0.0  ;;  %v467_v62 = vmul.f32 %v3096_v61, %v3096_v61  ;;  %v492_v63 = vmul.f32 %v51_v55, %v51_v55  ;;  %v3201_v50 = vld [vmem:[%s5134_s0 + $0x88] sm:$0xff] }
   0xd   :  { %537 = vadd.xlane.f32.xlu0 %v536_v38  ;;  %v516_v60 = vadd.f32 %v491_v57, %v466_v56  ;;  %v468_v16 = vmul.f32 %v3106_v12, %v3106_v12  ;;  %v493_v17 = vmul.f32 %v52_v46, %v52_v46  ;;  %v469_v26 = vmul.f32 %v3116_v22, %v3116_v22  ;;  %v3219_v56 = vld [vmem:[%s5134_s0 + $0x90] sm:$0xff]  ;;  %v66_v57 = vld [vmem:[%s5133_s1 + $0xc0] sm:$0xff] }
   0xe   :  { %2442 = vmatpush1.xpose.msk.msra.mxu0 %vm92_vm0, %v3004_v18  ;;  %543 = vadd.xlane.f32.xlu1 %v542_v42  ;;  %v554_v59 = vsel %vm92_vm0, %v515_v52, 0.0  ;;  %v517_v9 = vadd.f32 %v492_v63, %v467_v62  ;;  %v494_v27 = vmul.f32 %v53_v34, %v53_v34  ;;  %v470_v31 = vmul.f32 %v3126_v29, %v3126_v29  ;;  %v3167_v42 = vld [vmem:[%s5134_s0 + $0x78] sm:$0xff] }
   0xf   :  { %251 = vmatprep.subr.mxu0 %v2896_v0  ;;  %v557_v8 = vsel %vm92_vm0, %v516_v60, 0.0  ;;  %v518_v21 = vadd.f32 %v493_v17, %v468_v16  ;;  %v495_v32 = vmul.f32 %v3004_v18, %v3004_v18  ;;  %v496_v18 = vmul.f32 %v2944_v3, %v2944_v3  ;;  %v3234_v62 = vld [vmem:[%s5133_s1 + $0x98] sm:$0xff] }
  0x10   :  { %v560_v13 = vsel %vm92_vm0, %v517_v9, 0.0  ;;  %v519_v28 = vadd.f32 %v494_v27, %v469_v26  ;;  %v497_v3 = vmul.f32 %v2936_v2, %v2936_v2  ;;  %v498_v41 = vmul.f32 %v2926_v1, %v2926_v1  ;;  %v3178_v1 = vld [vmem:[%s5133_s1 + $0x80] sm:$0xff]  ;;  %v3239_v63 = vld [vmem:[%s5134_s0 + $0x98] sm:$0xff]  ;;  %v64_v9 = vld [vmem:[%s5133_s1 + $0xb0] sm:$0xff] }
  0x11   :  { %546 = vadd.xlane.f32.xlu0 %v545_v49  ;;  %v563_v25 = vsel %vm92_vm0, %v518_v21, 0.0  ;;  %v520_v33 = vadd.f32 %v495_v32, %v470_v31  ;;  %v473_v2 = vmul.f32 %v3167_v42, %v3167_v42  ;;  %v3196_v49 = vld [vmem:[%s5133_s1 + $0x88] sm:$0xff]  ;;  %v475_v52 = vmul.f32 %v3201_v50, %v3201_v50  ;;  %v62_v21 = vld [vmem:[%s5133_s1 + $0xa0] sm:$0xff] }
  0x12   :  { %2443 = vmatpush1.xpose.msk.msra.mxu0 %vm92_vm0, %v53_v34  ;;  %549 = vadd.xlane.f32.xlu1 %v548_v51  ;;  %v566_v30 = vsel %vm92_vm0, %v519_v28, 0.0  ;;  %v3139_v34 = vld [vmem:[%s5134_s0 + $0x68] sm:$0xff]  ;;  %v477_v16 = vmul.f32 %v3239_v63, %v3239_v63  ;;  %v502_v17 = vmul.f32 %v3234_v62, %v3234_v62  ;;  %v3272_v28 = vld [vmem:[%s5134_s0 + $0xb0] sm:$0xff] }
  0x13   :  { %253 = vmatprep.subr.mxu0 %v2896_v0  ;;  %v471_v37 = vmul.f32 %v3139_v34, %v3139_v34  ;;  %v3264_v26 = vld [vmem:[%s5134_s0 + $0xa8] sm:$0xff] }
  0x14   :  { %v63_v27 = vld [vmem:[%s5133_s1 + $0xa8] sm:$0xff]  ;;  %v527_v31 = vadd.f32 %v502_v17, %v477_v16  ;;  %v74_v16 = vld [vmem:[%s5135_s2 + $0x38] sm:$0xff]  ;;  %v73_v17 = vld [vmem:[%s5135_s2 + $0x30] sm:$0xff] }
  0x15   :  { %552 = vadd.xlane.f32.xlu0 %v551_v58  ;;  %v521_v38 = vadd.f32 %v496_v18, %v471_v37  ;;  %v3287_v37 = vld [vmem:[%s5134_s0 + $0xc0] sm:$0xff]  ;;  %v504_v18 = vmul.f32 %v63_v27, %v63_v27 }
  0x16   :  { %2444 = vmatpush1.xpose.msk.msra.mxu0 %vm92_vm0, %v52_v46  ;;  %555 = vadd.xlane.f32.xlu1 %v554_v59 }
  0x17   :  { %255 = vmatprep.subr.mxu0 %v2896_v0  ;;  %v572_v39 = vsel %vm92_vm0, %v521_v38, 0.0  ;;  %v480_v38 = vmul.f32 %v3272_v28, %v3272_v28 }
  0x19   :  { %558 = vadd.xlane.f32.xlu0 %v557_v8  ;;  %v65_v8 = vld [vmem:[%s5133_s1 + $0xb8] sm:$0xff] }
  0x1a   :  { %2445 = vmatpush1.xpose.msk.msra.mxu0 %vm92_vm0, %v51_v55  ;;  %561 = vadd.xlane.f32.xlu1 %v560_v13  ;;  %v3214_v55 = vld [vmem:[%s5133_s1 + $0x90] sm:$0xff] }
  0x1b   :  { %257 = vmatprep.subr.mxu0 %v2896_v0  ;;  %v501_v59 = vmul.f32 %v3214_v55, %v3214_v55 }
  0x1d   :  { %564 = vadd.xlane.f32.xlu0 %v563_v25  ;;  %v3259_v25 = vld [vmem:[%s5134_s0 + $0xa0] sm:$0xff] }
  0x1e   :  { %2446 = vmatpush1.xpose.msk.msra.mxu0 %vm92_vm0, %v50_v53  ;;  %567 = vadd.xlane.f32.xlu1 %v566_v30  ;;  %v3277_v30 = vld [vmem:[%s5134_s0 + $0xb8] sm:$0xff]  ;;  %v478_v32 = vmul.f32 %v3259_v25, %v3259_v25 }
  0x1f   :  { %259 = vmatprep.subr.mxu0 %v2896_v0 }
  0x22   :  { %2447 = vmatpush1.xpose.msk.msra.mxu0 %vm92_vm0, %v49_v44  ;;  %573 = vadd.xlane.f32.xlu1 %v572_v39  ;;  %v523_v44 = vadd.f32 %v498_v41, %v473_v2  ;;  %v505_v39 = vmul.f32 %v64_v9, %v64_v9  ;;  %v81_v41 = vld [vmem:[%s5135_s2 + $0x70] sm:$0xff]  ;;  %v506_v2 = vmul.f32 %v65_v8, %v65_v8 }
  0x23   :  { %261 = vmatprep.subr.mxu0 %v2896_v0 }
  0x24   :  { %v578_v46 = vsel %vm92_vm0, %v523_v44, 0.0  ;;  %v482_v44 = vmul.f32 %v3287_v37, %v3287_v37 }
  0x26   :  { %2448 = vmatpush1.xpose.msk.msra.mxu0 %vm92_vm0, %v48_v35  ;;  %v569_v35 = vsel %vm92_vm0, %v520_v33, 0.0  ;;  %579 = vadd.xlane.f32.xlu1 %v578_v46  ;;  %v503_v33 = vmul.f32 %v62_v21, %v62_v21 }
  0x27   :  { %263 = vmatprep.subr.mxu0 %v2896_v0  ;;  %570 = vadd.xlane.f32.xlu0 %v569_v35  ;;  %v479_v35 = vmul.f32 %v3264_v26, %v3264_v26 }
  0x29   :  { %v529_v46 = vadd.f32 %v504_v18, %v479_v35 }
  0x2a   :  { %2449 = vmatpush1.xpose.msk.msra.mxu0 %vm92_vm0, %v3023_v23  ;;  %v3152_v23 = vld [vmem:[%s5134_s0 + $0x70] sm:$0xff] }
  0x2b   :  { %265 = vmatprep.subr.mxu0 %v2896_v0  ;;  %v472_v40 = vmul.f32 %v3152_v23, %v3152_v23 }
  0x2e   :  { %2450 = vmatpush1.xpose.msk.msra.mxu0 %vm92_vm0, %v3009_v19  ;;  %v522_v19 = vadd.f32 %v497_v3, %v472_v40  ;;  %v481_v40 = vmul.f32 %v3277_v30, %v3277_v30  ;;  %v82_v3 = vld [vmem:[%s5135_s2 + $0x78] sm:$0xff] }
  0x2f   :  { %267 = vmatprep.subr.mxu0 %v2896_v0  ;;  %1010 = vmatpush1.msra.mxu1 %v82_v3  ;;  %v833_v3 = vld [vmem:[%s5136_s3] sm:$0xff] }
  0x30   :  { %v575_v43 = vsel %vm92_vm0, %v522_v19, 0.0  ;;  %v590_v19 = vsel %vm92_vm0, %v527_v31, 0.0  ;;  %1011 = vmatprep.subr.mxu1 %v2896_v0  ;;  %v67_v31 = vld [vmem:[%s5135_s2] sm:$0xff] }
  0x31   :  { %576 = vadd.xlane.f32.xlu0 %v575_v43  ;;  %v528_v43 = vadd.f32 %v503_v33, %v478_v32  ;;  %1012 = vmatpush1.msra.mxu1 %v81_v41  ;;  %v89_v32 = vld [vmem:[%s5135_s2 + $0xb0] sm:$0xff]  ;;  %v87_v33 = vld [vmem:[%s5135_s2 + $0xa0] sm:$0xff] }
  0x32   :  { %2451 = vmatpush1.xpose.msk.msra.mxu0 %vm92_vm0, %v2959_v6  ;;  %v3183_v6 = vld [vmem:[%s5134_s0 + $0x80] sm:$0xff]  ;;  %1013 = vmatprep.subr.mxu1 %v2896_v0 }
  0x33   :  { %269 = vmatprep.subr.mxu0 %v2896_v0  ;;  %v474_v47 = vmul.f32 %v3183_v6, %v3183_v6 }
  0x36   :  { %2452 = vmatpush1.xpose.msk.msra.mxu0 %vm92_vm0, %v2964_v7  ;;  %v499_v7 = vmul.f32 %v3178_v1, %v3178_v1 }
  0x37   :  { %271 = vmatprep.subr.mxu0 %v2896_v0 }
  0x38   :  { %v524_v48 = vadd.f32 %v499_v7, %v474_v47  ;;  %v530_v47 = vadd.f32 %v505_v39, %v480_v38  ;;  %v507_v7 = vmul.f32 %v66_v57, %v66_v57  ;;  %v834_v38 = vld [vmem:[%s5136_s3 + $0x8] sm:$0xff] }
  0x3a   :  { %2453 = vmatpush1.xpose.msk.msra.mxu0 %vm92_vm0, %v2949_v4  ;;  %v581_v51 = vsel %vm92_vm0, %v524_v48, 0.0  ;;  %v500_v4 = vmul.f32 %v3196_v49, %v3196_v49  ;;  %v593_v48 = vsel %vm92_vm0, %v528_v43, 0.0 }
  0x3b   :  { %273 = vmatprep.subr.mxu0 %v2896_v0  ;;  %582 = vadd.xlane.f32.xlu0 %v581_v51  ;;  %v531_v51 = vadd.f32 %v506_v2, %v481_v40 }
  0x3c   :  { %v525_v53 = vadd.f32 %v500_v4, %v475_v52  ;;  %v80_v52 = vld [vmem:[%s5135_s2 + $0x68] sm:$0xff]  ;;  %v596_v4 = vsel %vm92_vm0, %v529_v46, 0.0 }
  0x3d   :  { %1014 = vmatpush1.msra.mxu1 %v80_v52 }
  0x3e   :  { %2454 = vmatpush1.xpose.msk.msra.mxu0 %vm92_vm0, %v2954_v5  ;;  %v584_v58 = vsel %vm92_vm0, %v525_v53, 0.0  ;;  %v476_v5 = vmul.f32 %v3219_v56, %v3219_v56  ;;  %v599_v53 = vsel %vm92_vm0, %v530_v47, 0.0  ;;  %1015 = vmatprep.subr.mxu1 %v2896_v0 }
  0x3f   :  { %289 = vmatprep.subr.mxu0 %v2896_v0  ;;  %585 = vadd.xlane.f32.xlu1 %v584_v58  ;;  %v79_v58 = vld [vmem:[%s5135_s2 + $0x60] sm:$0xff] }
  0x40   :  { %v526_v60 = vadd.f32 %v501_v59, %v476_v5  ;;  %v602_v5 = vsel %vm92_vm0, %v531_v51, 0.0  ;;  %v78_v59 = vld [vmem:[%s5135_s2 + $0x58] sm:$0xff]  ;;  %1016 = vmatpush1.msra.mxu1 %v79_v58  ;;  %v835_v58 = vld [vmem:[%s5136_s3 + $0x10] sm:$0xff] }
  0x41   :  { %1017 = vmatprep.subr.mxu1 %v2896_v0  ;;  %v836_v51 = vld [vmem:[%s5136_s3 + $0x18] sm:$0xff] }
  0x42   :  { %2455 = vmatpush2.xpose.msk.msra.mxu0 %vm92_vm0, %v66_v57  ;;  %v587_v13 = vsel %vm92_vm0, %v526_v60, 0.0  ;;  %v532_v57 = vadd.f32 %v507_v7, %v482_v44  ;;  %1018 = vmatpush1.msra.mxu1 %v78_v59 }
  0x43   :  { %291 = vmatprep.subr.mxu0 %v2896_v0  ;;  %588 = vadd.xlane.f32.xlu0 %v587_v13  ;;  %v75_v13 = vld [vmem:[%s5135_s2 + $0x40] sm:$0xff] }
  0x44   :  { %591 = vadd.xlane.f32.xlu1 %v590_v19  ;;  %v605_v60 = vsel %vm92_vm0, %v532_v57, 0.0  ;;  %1019 = vmatprep.subr.mxu1 %v2896_v0 }
  0x46   :  { %2456 = vmatpush2.xpose.msk.msra.mxu0 %vm92_vm0, %v65_v8  ;;  %v77_v8 = vld [vmem:[%s5135_s2 + $0x50] sm:$0xff] }
  0x47   :  { %293 = vmatprep.subr.mxu0 %v2896_v0  ;;  %594 = vadd.xlane.f32.xlu0 %v593_v48 }
  0x48   :  { %597 = vadd.xlane.f32.xlu1 %v596_v4  ;;  %1020 = vmatpush1.msra.mxu1 %v77_v8  ;;  %v3532_v4 = vld [vmem:[%s5133_s1 + $0x140] sm:$0xff] }
  0x49   :  { %1021 = vmatprep.subr.mxu1 %v2896_v0 }
  0x4a   :  { %2457 = vmatpush2.xpose.msk.msra.mxu0 %vm92_vm0, %v64_v9  ;;  %v76_v9 = vld [vmem:[%s5135_s2 + $0x48] sm:$0xff] }
  0x4b   :  { %295 = vmatprep.subr.mxu0 %v2896_v0  ;;  %600 = vadd.xlane.f32.xlu0 %v599_v53 }
  0x4c   :  { %603 = vadd.xlane.f32.xlu1 %v602_v5  ;;  %1022 = vmatpush1.msra.mxu1 %v76_v9 }
  0x4d   :  { %1023 = vmatprep.subr.mxu1 %v2896_v0 }
  0x4e   :  { %2458 = vmatpush2.xpose.msk.msra.mxu0 %vm92_vm0, %v63_v27  ;;  %1024 = vmatpush1.msra.mxu1 %v75_v13  ;;  %v69_v27 = vld [vmem:[%s5135_s2 + $0x10] sm:$0xff] }
  0x4f   :  { %297 = vmatprep.subr.mxu0 %v2896_v0  ;;  %606 = vadd.xlane.f32.xlu0 %v605_v60 }
  0x50   :  { %1025 = vmatprep.subr.mxu1 %v2896_v0 }
  0x51   :  { %1026 = vmatpush1.msra.mxu1 %v74_v16 }
  0x52   :  { %2459 = vmatpush2.xpose.msk.msra.mxu0 %vm92_vm0, %v62_v21  ;;  %1027 = vmatprep.subr.mxu1 %v2896_v0  ;;  %v71_v21 = vld [vmem:[%s5135_s2 + $0x20] sm:$0xff] }
  0x53   :  { %299 = vmatprep.subr.mxu0 %v2896_v0  ;;  %1028 = vmatpush1.msra.mxu1 %v73_v17 }
  0x54   :  { %1029 = vmatprep.subr.mxu1 %v2896_v0 }
  0x56   :  { %2460 = vmatpush2.xpose.msk.msra.mxu0 %vm92_vm0, %v3234_v62  ;;  %v72_v62 = vld [vmem:[%s5135_s2 + $0x28] sm:$0xff] }
  0x57   :  { %301 = vmatprep.subr.mxu0 %v2896_v0  ;;  %1030 = vmatpush1.msra.mxu1 %v72_v62 }
  0x58   :  { %1031 = vmatprep.subr.mxu1 %v2896_v0 }
  0x59   :  { %1032 = vmatpush1.msra.mxu1 %v71_v21 }
  0x5a   :  { %2461 = vmatpush2.xpose.msk.msra.mxu0 %vm92_vm0, %v3214_v55  ;;  %v70_v55 = vld [vmem:[%s5135_s2 + $0x18] sm:$0xff]  ;;  %1033 = vmatprep.subr.mxu1 %v2896_v0 }
  0x5b   :  { %303 = vmatprep.subr.mxu0 %v2896_v0  ;;  %1034 = vmatpush1.msra.mxu1 %v70_v55  ;;  %v838_v55 = vld [vmem:[%s5136_s3 + $0x28] sm:$0xff] }
  0x5c   :  { %1035 = vmatprep.subr.mxu1 %v2896_v0 }
  0x5d   :  { %1036 = vmatpush1.msra.mxu1 %v69_v27 }
  0x5e   :  { %2462 = vmatpush2.xpose.msk.msra.mxu0 %vm92_vm0, %v3196_v49  ;;  %v68_v49 = vld [vmem:[%s5135_s2 + $0x8] sm:$0xff]  ;;  %1037 = vmatprep.subr.mxu1 %v2896_v0 }
  0x5f   :  { %305 = vmatprep.subr.mxu0 %v2896_v0  ;;  %1038 = vmatpush1.msra.mxu1 %v68_v49  ;;  %v3559_v49 = vld [vmem:[%s5133_s1 + $0x138] sm:$0xff] }
  0x60   :  { %1039 = vmatprep.subr.mxu1 %v2896_v0 }
  0x61   :  { %1040 = vmatpush1.msra.mxu1 %v67_v31 }
  0x62   :  { %2463 = vmatpush2.xpose.msk.msra.mxu0 %vm92_vm0, %v3178_v1  ;;  %v91_v1 = vld [vmem:[%s5135_s2 + $0xc0] sm:$0xff]  ;;  %1055 = vmatprep.subr.mxu1 %v2896_v0 }
  0x63   :  { %2219 = vmatprep.subr.mxu0 %v2896_v0  ;;  %1056 = vmatpush2.msra.mxu1 %v91_v1  ;;  %v837_v1 = vld [vmem:[%s5136_s3 + $0x20] sm:$0xff] }
  0x64   :  { %1057 = vmatprep.subr.mxu1 %v2896_v0 }
  0x65   :  { %2464 = vmatmul.mubr.msk.f32.vlgmr.msra.gmra.mxu0 %vm92_vm0, %v2973_v10  ;;  %v90_v10 = vld [vmem:[%s5135_s2 + $0xb8] sm:$0xff] }
  0x66   :  { %313 = vmatprep.mubr.f32.mxu0 %v2896_v0  ;;  %1058 = vmatpush2.msra.mxu1 %v90_v10 }
  0x67   :  { %1059 = vmatprep.subr.mxu1 %v2896_v0 }
  0x68   :  { %1060 = vmatpush2.msra.mxu1 %v89_v32  ;;  %v3571_v32 = vld [vmem:[%s5133_s1 + $0xc8] sm:$0xff] }
  0x69   :  { %2465 = vmatmul.mubr.msk.f32.gmra.mxu0 %vm92_vm0, %v2978_v11  ;;  %v88_v11 = vld [vmem:[%s5135_s2 + $0xa8] sm:$0xff]  ;;  %1061 = vmatprep.subr.mxu1 %v2896_v0 }
  0x6a   :  { %319 = vmatprep.mubr.f32.mxu0 %v2896_v0  ;;  %1062 = vmatpush2.msra.mxu1 %v88_v11  ;;  %v2514_v11 = vld [vmem:[%s5134_s0 + $0xc8] sm:$0xff] }
  0x6b   :  { %1063 = vmatprep.subr.mxu1 %v2896_v0 }
  0x6c   :  { %1064 = vmatpush2.msra.mxu1 %v87_v33 }
  0x6d   :  { %2466 = vmatmul.mubr.msk.f32.gmra.mxu0 %vm92_vm0, %v2989_v14  ;;  %v86_v14 = vld [vmem:[%s5135_s2 + $0x98] sm:$0xff]  ;;  %1065 = vmatprep.subr.mxu1 %v2896_v0 }
  0x6e   :  { %325 = vmatprep.mubr.f32.mxu0 %v2896_v0  ;;  %1066 = vmatpush2.msra.mxu1 %v86_v14 }
  0x6f   :  { %1067 = vmatprep.subr.mxu1 %v2896_v0 }
  0x71   :  { %2467 = vmatmul.mubr.msk.f32.gmra.mxu0 %vm92_vm0, %v2994_v15  ;;  %v85_v15 = vld [vmem:[%s5135_s2 + $0x90] sm:$0xff] }
  0x72   :  { %331 = vmatprep.mubr.f32.mxu0 %v2896_v0  ;;  %1068 = vmatpush2.msra.mxu1 %v85_v15  ;;  %v1668_v15 = vmul.f32 %v2514_v11, %v2514_v11 }
  0x73   :  { %1069 = vmatprep.subr.mxu1 %v2896_v0 }
  0x75   :  { %2468 = vmatmul.mubr.msk.f32.gmra.mxu0 %vm92_vm0, %v3014_v20  ;;  %v84_v20 = vld [vmem:[%s5135_s2 + $0x88] sm:$0xff] }
  0x76   :  { %337 = vmatprep.mubr.f32.mxu0 %v2896_v0  ;;  %1070 = vmatpush2.msra.mxu1 %v84_v20  ;;  %v1693_v20 = vmul.f32 %v3571_v32, %v3571_v32 }
  0x77   :  { %1071 = vmatprep.subr.mxu1 %v2896_v0 }
  0x79   :  { %2469 = vmatmul.mubr.msk.f32.gmra.mxu0 %vm92_vm0, %v3028_v24  ;;  %v83_v24 = vld [vmem:[%s5135_s2 + $0x80] sm:$0xff] }
  0x7a   :  { %343 = vmatprep.mubr.f32.mxu0 %v2896_v0  ;;  %1072 = vmatpush2.msra.mxu1 %v83_v24 }
  0x7b   :  { %1453 = vmatprep.subr.mxu1 %v2896_v0 }
  0x7d   :  { %2470 = vmatmul.mubr.msk.f32.gmra.mxu0 %vm92_vm0, %v3051_v36 }
  0x7e   :  { %349 = vmatprep.mubr.f32.mxu0 %v2896_v0 }
  0x81   :  { %2471 = vmatmul.mubr.msk.f32.gmra.mxu0 %vm92_vm0, %v3065_v45 }
  0x82   :  { %355 = vmatprep.mubr.f32.mxu0 %v2896_v0 }
  0x85   :  { %2472 = vmatmul.mubr.msk.f32.gmra.mxu0 %vm92_vm0, %v3082_v54 }
  0x86   :  { %361 = vmatprep.mubr.f32.mxu0 %v2896_v0 }
  0x89   :  { %2473 = vmatmul.mubr.msk.f32.gmra.mxu0 %vm92_vm0, %v3096_v61 }
  0x8a   :  { %367 = vmatprep.mubr.f32.mxu0 %v2896_v0 }
  0x8d   :  { %2474 = vmatmul.mubr.msk.f32.gmra.mxu0 %vm92_vm0, %v3106_v12 }
  0x8e   :  { %373 = vmatprep.mubr.f32.mxu0 %v2896_v0 }
  0x91   :  { %2475 = vmatmul.mubr.msk.f32.gmra.mxu0 %vm92_vm0, %v3116_v22 }
  0x92   :  { %379 = vmatprep.mubr.f32.mxu0 %v2896_v0  ;;  %v535_v36 = vpop.xlane.xlu0 %534 }
  0x93   :  { %2790 = vrsqrt.f32 %v535_v36  ;;  %v3494_v54 = vpop.xlane.xlu1 %540  ;;  %vm610_vm1 = vcmp.eq.f32.partialorder %v535_v36, inf  ;;  %vm612_vm2 = vcmp.eq.f32.partialorder %v535_v36, 0.0 }
  0x94   :  { %vm624_vm5 = vcmp.eq.f32.partialorder %v3494_v54, inf  ;;  %vm626_vm7 = vcmp.eq.f32.partialorder %v3494_v54, 0.0  ;;  %v627_v44 = vand.u32 2147483648, %v3494_v54 }
  0x95   :  { %2476 = vmatmul.mubr.msk.f32.gmra.mxu0 %vm92_vm0, %v3126_v29 }
  0x96   :  { %385 = vmatprep.mubr.f32.mxu0 %v2896_v0  ;;  %v538_v45 = vpop.xlane.xlu0 %537 }
  0x97   :  { %2792 = vrsqrt.f32 %v538_v45  ;;  %v3497_v61 = vpop.xlane.xlu1 %543  ;;  %vm617_vm3 = vcmp.eq.f32.partialorder %v538_v45, inf  ;;  %vm619_vm4 = vcmp.eq.f32.partialorder %v538_v45, 0.0 }
  0x98   :  { %2794 = vrsqrt.f32 %v3494_v54  ;;  %vm631_vm8 = vcmp.eq.f32.partialorder %v3497_v61, inf  ;;  %v634_v8 = vand.u32 2147483648, %v3497_v61  ;;  %vm633_vm9 = vcmp.eq.f32.partialorder %v3497_v61, 0.0 }
  0x99   :  { %2477 = vmatmul.mubr.msk.f32.gmra.mxu0 %vm92_vm0, %v3139_v34  ;;  %2796 = vrsqrt.f32 %v3497_v61 }
  0x9a   :  { %391 = vmatprep.mubr.f32.mxu0 %v2896_v0  ;;  %v3500_v22 = vpop.xlane.xlu0 %546 }
  0x9b   :  { %2798 = vrsqrt.f32 %v3500_v22  ;;  %v3503_v29 = vpop.xlane.xlu1 %549  ;;  %vm638_vm10 = vcmp.eq.f32.partialorder %v3500_v22, inf  ;;  %vm640_vm11 = vcmp.eq.f32.partialorder %v3500_v22, 0.0  ;;  %v641_v14 = vand.u32 2147483648, %v3500_v22 }
  0x9c   :  { %2800 = vrsqrt.f32 %v3503_v29  ;;  %vm645_vm12 = vcmp.eq.f32.partialorder %v3503_v29, inf  ;;  %vm647_vm13 = vcmp.eq.f32.partialorder %v3503_v29, 0.0 }
  0x9d   :  { %2478 = vmatmul.mubr.msk.f32.gmra.mxu0 %vm92_vm0, %v3152_v23 }
  0x9e   :  { %397 = vmatprep.mubr.f32.mxu0 %v2896_v0 }
  0xa0   :  { %v2791_v12 = vpop.eup %2790 }
  0xa1   :  { %2479 = vmatmul.mubr.msk.f32.gmra.mxu0 %vm92_vm0, %v3167_v42  ;;  %v609_v34 = vmul.f32 %v2791_v12, %v535_v36  ;;  %v613_v42 = vand.u32 2147483648, %v535_v36 }
  0xa2   :  { %403 = vmatprep.mubr.f32.mxu0 %v2896_v0 }
  0xa4   :  { %v2793_v23 = vpop.eup %2792 }
  0xa5   :  { %2480 = vmatmul.mubr.msk.f32.gmra.mxu0 %vm92_vm0, %v3183_v6  ;;  %v611_v6 = vsel %vm610_vm1, %v535_v36, %v609_v34 }
  0xa6   :  { %409 = vmatprep.mubr.f32.mxu0 %v2896_v0 }
  0xa9   :  { %2481 = vmatmul.mubr.msk.f32.gmra.mxu0 %vm92_vm0, %v3201_v50  ;;  %v616_v50 = vmul.f32 %v2793_v23, %v538_v45 }
  0xaa   :  { %415 = vmatprep.mubr.f32.mxu0 %v2896_v0 }
  0xab   :  { %v618_v18 = vsel %vm617_vm3, %v538_v45, %v616_v50  ;;  %v1718_v50 = vadd.f32 %v1693_v20, %v1668_v15  ;;  %v843_v20 = vld [vmem:[%s5136_s3 + $0x50] sm:$0xff] }
  0xad   :  { %2482 = vmatmul.mubr.msk.f32.gmra.mxu0 %vm92_vm0, %v3219_v56  ;;  %v2795_v56 = vpop.eup %2794 }
  0xae   :  { %421 = vmatprep.mubr.f32.mxu0 %v2896_v0  ;;  %v623_v39 = vmul.f32 %v2795_v56, %v3494_v54  ;;  %v2797_v40 = vpop.eup %2796 }
  0xaf   :  { %v630_v53 = vmul.f32 %v2797_v40, %v3497_v61  ;;  %v2799_v57 = vpop.eup %2798 }
  0xb0   :  { %v625_v52 = vsel %vm624_vm5, %v3494_v54, %v623_v39  ;;  %v2801_v16 = vpop.eup %2800  ;;  %v637_v31 = vmul.f32 %v2799_v57, %v3500_v22  ;;  %v1743_v39 = vsel %vm92_vm0, %v1718_v50, 0.0 }
  0xb1   :  { %2483 = vmatmul.mubr.msk.f32.gmra.mxu0 %vm92_vm0, %v3239_v63  ;;  %v3506_v63 = vpop.xlane.xlu0 %552  ;;  %v628_v13 = vsel %vm626_vm7, %v627_v44, %v625_v52  ;;  %v632_v27 = vsel %vm631_vm8, %v3497_v61, %v630_v53  ;;  %1744 = vadd.xlane.f32.xlu1 %v1743_v39  ;;  %v841_v53 = vld [vmem:[%s5136_s3 + $0x40] sm:$0xff]  ;;  %v846_v39 = vld [vmem:[%s5136_s3 + $0x68] sm:$0xff] }
  0xb2   :  { %427 = vmatprep.mubr.f32.mxu0 %v2896_v0  ;;  %2802 = vrsqrt.f32 %v3506_v63  ;;  %v635_v36 = vsel %vm633_vm9, %v634_v8, %v632_v27  ;;  %v639_v61 = vsel %vm638_vm10, %v3500_v22, %v637_v31  ;;  %v3634_v22 = vld [vmem:[%s5133_s1 + $0x128] sm:$0xff]  ;;  %vm652_vm14 = vcmp.eq.f32.partialorder %v3506_v63, inf }
  0xb3   :  { %vm654_vm15 = vcmp.eq.f32.partialorder %v3506_v63, 0.0 }
  0xb5   :  { %2484 = vmatmul.mubr.msk.f32.gmra.mxu0 %vm92_vm0, %v3259_v25  ;;  %v3523_v46 = vpop.xlane.xlu0 %558 }
  0xb6   :  { %433 = vmatprep.mubr.f32.mxu0 %v2896_v0  ;;  %vm666_vm3 = vcmp.eq.f32.partialorder %v3523_v46, inf  ;;  %vm668_vm5 = vcmp.eq.f32.partialorder %v3523_v46, 0.0 }
  0xb9   :  { %2485 = vmatmul.mubr.msk.f32.gmra.mxu0 %vm92_vm0, %v3264_v26  ;;  %v614_v26 = vsel %vm612_vm2, %v613_v42, %v611_v6  ;;  %v3586_v54 = vpop.xlane.xlu0 %564  ;;  %v840_v42 = vld [vmem:[%s5136_s3 + $0x38] sm:$0xff]  ;;  %v3598_v6 = vld [vmem:[%s5133_s1 + $0x130] sm:$0xff] }
  0xba   :  { %439 = vmatprep.mubr.f32.mxu0 %v2896_v0  ;;  %vm680_vm8 = vcmp.eq.f32.partialorder %v3586_v54, inf  ;;  %vm682_vm10 = vcmp.eq.f32.partialorder %v3586_v54, 0.0 }
  0xbd   :  { %2486 = vmatmul.mubr.msk.f32.gmra.mxu0 %vm92_vm0, %v3272_v28  ;;  %v620_v28 = vand.u32 2147483648, %v538_v45  ;;  %v644_v45 = vmul.f32 %v2801_v16, %v3503_v29  ;;  %v3652_v8 = vpop.xlane.xlu0 %570 }
  0xbe   :  { %445 = vmatprep.mubr.f32.mxu0 %v2896_v0 }
  0xbf   :  { %v621_v43 = vsel %vm619_vm4, %v620_v28, %v618_v18  ;;  %v2803_v56 = vpop.eup %2802  ;;  %v648_v28 = vand.u32 2147483648, %v3503_v29 }
  0xc1   :  { %2487 = vmatmul.mubr.msk.f32.gmra.mxu0 %vm92_vm0, %v3277_v30  ;;  %v3509_v30 = vpop.xlane.xlu1 %555 }
  0xc2   :  { %451 = vmatprep.mubr.f32.mxu0 %v2896_v0  ;;  %2804 = vrsqrt.f32 %v3509_v30  ;;  %vm659_vm1 = vcmp.eq.f32.partialorder %v3509_v30, inf  ;;  %vm661_vm2 = vcmp.eq.f32.partialorder %v3509_v30, 0.0 }
  0xc3   :  { %2806 = vrsqrt.f32 %v3523_v46 }
  0xc5   :  { %2488 = vmatmul.mubr.msk.f32.gmra.mxu0 %vm92_vm0, %v3287_v37  ;;  %v3540_v59 = vpop.xlane.xlu1 %561 }
  0xc6   :  { %2808 = vrsqrt.f32 %v3540_v59  ;;  %vm673_vm4 = vcmp.eq.f32.partialorder %v3540_v59, inf  ;;  %vm675_vm7 = vcmp.eq.f32.partialorder %v3540_v59, 0.0 }
  0xc7   :  { %2810 = vrsqrt.f32 %v3586_v54 }
  0xc9   :  { %v3613_v18 = vpop.xlane.xlu1 %567 }
  0xca   :  { %2812 = vrsqrt.f32 %v3613_v18  ;;  %vm687_vm9 = vcmp.eq.f32.partialorder %v3613_v18, inf }
  0xcb   :  { %2814 = vrsqrt.f32 %v3652_v8 }
 0x125   :  { %v309_v25 = vpop.f32.mrf.mxu0 }
 0x126   :  { %v783_v35 = vmul.f32 %v614_v26, %v309_v25  ;;  %v839_v25 = vld [vmem:[%s5136_s3 + $0x30] sm:$0xff] }
 0x127   :  { %v311_v37 = vpop.f32.mrf.mxu0 }
 0x128   :  { %v784_v41 = vmul.f32 %v614_v26, %v311_v37  ;;  %v883_v47 = vmul.f32 %v833_v3, %v783_v35  ;;  %v3608_v35 = vld [vmem:[%s5133_s1 + $0xd0] sm:$0xff] }
 0x129   :  { %v315_v19 = vpop.f32.mrf.mxu0  ;;  %v2515_v37 = vld [vmem:[%s5134_s0 + $0xd0] sm:$0xff]  ;;  %v1694_v3 = vmul.f32 %v3608_v35, %v3608_v35 }
 0x12a   :  { %v884_v2 = vmul.f32 %v834_v38, %v784_v41  ;;  %v785_v7 = vmul.f32 %v621_v43, %v315_v19  ;;  %v1669_v40 = vmul.f32 %v2515_v37, %v2515_v37  ;;  %v642_v19 = vsel %vm640_vm11, %v641_v14, %v639_v61  ;;  %v3676_v14 = vld [vmem:[%s5133_s1 + $0x120] sm:$0xff] }
 0x12b   :  { %v317_v48 = vpop.f32.mrf.mxu0  ;;  %vm689_vm11 = vcmp.eq.f32.partialorder %v3613_v18, 0.0 }
 0x12c   :  { %v786_v5 = vmul.f32 %v621_v43, %v317_v48  ;;  %2489 = vmatprep.mubr.msk.f32.mxu1 %vm933_vm6, %v884_v2  ;;  %v885_v17 = vmul.f32 %v835_v58, %v785_v7  ;;  %v646_v43 = vsel %vm645_vm12, %v3503_v29, %v644_v45  ;;  %v2805_v2 = vpop.eup %2804  ;;  %v842_v48 = vld [vmem:[%s5136_s3 + $0x48] sm:$0xff]  ;;  %v1719_v52 = vadd.f32 %v1694_v3, %v1669_v40  ;;  %v3687_v45 = vld [vmem:[%s5133_s1 + $0xe0] sm:$0xff] }
 0x12d   :  { %v321_v60 = vpop.f32.mrf.mxu0  ;;  %1074 = vmatmul.mubr.f32.vlgmr.msra.gmra.mxu1 %v883_v47  ;;  %v655_v58 = vand.u32 2147483648, %v3506_v63  ;;  %v2807_v27 = vpop.eup %2806  ;;  %v1696_v50 = vmul.f32 %v3687_v45, %v3687_v45  ;;  %vm694_vm12 = vcmp.eq.f32.partialorder %v3652_v8, inf }
 0x12e   :  { %v886_v9 = vmul.f32 %v836_v51, %v786_v5  ;;  %2589 = vmatpush1.xpose.msk.msra.mxu1 %vm92_vm0, %v3532_v4  ;;  %v787_v62 = vmul.f32 %v628_v13, %v321_v60  ;;  %v651_v51 = vmul.f32 %v2803_v56, %v3506_v63  ;;  %v3647_v5 = vld [vmem:[%s5133_s1 + $0xd8] sm:$0xff]  ;;  %v665_v40 = vmul.f32 %v2807_v27, %v3523_v46  ;;  %v847_v27 = vld [vmem:[%s5136_s3 + $0x70] sm:$0xff] }
 0x12f   :  { %v323_v21 = vpop.f32.mrf.mxu0  ;;  %1455 = vmatprep.subr.mxu1 %v2896_v0  ;;  %v2516_v60 = vld [vmem:[%s5134_s0 + $0xd8] sm:$0xff] }
 0x130   :  { %v788_v10 = vmul.f32 %v628_v13, %v323_v21  ;;  %2490 = vmatprep.mubr.msk.f32.mxu1 %vm933_vm6, %v886_v9  ;;  %v887_v12 = vmul.f32 %v837_v1, %v787_v62  ;;  %v1746_v13 = vsel %vm92_vm0, %v1719_v52, 0.0  ;;  %v1670_v16 = vmul.f32 %v2516_v60, %v2516_v60  ;;  %v3664_v1 = vpop.xlane.xlu1 %573 }
 0x131   :  { %v327_v33 = vpop.f32.mrf.mxu0  ;;  %1079 = vmatmul.mubr.f32.gmra.mxu1 %v885_v17  ;;  %v1695_v17 = vmul.f32 %v3647_v5, %v3647_v5  ;;  %v649_v21 = vsel %vm647_vm13, %v648_v28, %v646_v43  ;;  %1747 = vadd.xlane.f32.xlu0 %v1746_v13  ;;  %v653_v29 = vsel %vm652_vm14, %v3506_v63, %v651_v51  ;;  %2816 = vrsqrt.f32 %v3664_v1  ;;  %v3711_v63 = vld [vmem:[%s5133_s1 + $0x118] sm:$0xff] }
 0x132   :  { %v888_v24 = vmul.f32 %v838_v55, %v788_v10  ;;  %2590 = vmatpush1.xpose.msk.msra.mxu1 %vm92_vm0, %v3559_v49  ;;  %v789_v34 = vmul.f32 %v635_v36, %v327_v33  ;;  %v658_v55 = vmul.f32 %v2805_v2, %v3509_v30  ;;  %v844_v33 = vld [vmem:[%s5136_s3 + $0x58] sm:$0xff]  ;;  %v3723_v2 = vld [vmem:[%s5133_s1 + $0xe8] sm:$0xff]  ;;  %vm701_vm13 = vcmp.eq.f32.partialorder %v3664_v1, inf }
 0x133   :  { %v329_v23 = vpop.f32.mrf.mxu0  ;;  %1457 = vmatprep.subr.mxu1 %v2896_v0  ;;  %v1720_v15 = vadd.f32 %v1695_v17, %v1670_v16  ;;  %v1697_v52 = vmul.f32 %v3723_v2, %v3723_v2  ;;  %vm696_vm14 = vcmp.eq.f32.partialorder %v3652_v8, 0.0 }
 0x134   :  { %v790_v26 = vmul.f32 %v635_v36, %v329_v23  ;;  %2491 = vmatprep.mubr.msk.f32.mxu1 %vm933_vm6, %v888_v24  ;;  %v889_v44 = vmul.f32 %v839_v25, %v789_v34  ;;  %v662_v36 = vand.u32 2147483648, %v3509_v30  ;;  %v2809_v34 = vpop.eup %2808  ;;  %v656_v25 = vsel %vm654_vm15, %v655_v58, %v653_v29  ;;  %v3740_v13 = vpop.xlane.xlu1 %579  ;;  %v2519_v29 = vld [vmem:[%s5134_s0 + $0xf0] sm:$0xff] }
 0x135   :  { %v333_v38 = vpop.f32.mrf.mxu0  ;;  %1084 = vmatmul.mubr.f32.gmra.mxu1 %v887_v12  ;;  %v2517_v12 = vld [vmem:[%s5134_s0 + $0xe0] sm:$0xff]  ;;  %v672_v43 = vmul.f32 %v2809_v34, %v3540_v59  ;;  %v669_v58 = vand.u32 2147483648, %v3523_v46  ;;  %v2811_v60 = vpop.eup %2810  ;;  %vm703_vm15 = vcmp.eq.f32.partialorder %v3664_v1, 0.0 }
 0x136   :  { %v890_v41 = vmul.f32 %v840_v42, %v790_v26  ;;  %2591 = vmatpush1.xpose.msk.msra.mxu1 %vm92_vm0, %v3598_v6  ;;  %v791_v47 = vmul.f32 %v642_v19, %v333_v38  ;;  %v1749_v42 = vsel %vm92_vm0, %v1720_v15, 0.0  ;;  %v1671_v61 = vmul.f32 %v2517_v12, %v2517_v12  ;;  %v2813_v15 = vpop.eup %2812 }
 0x137   :  { %v335_v7 = vpop.f32.mrf.mxu0  ;;  %1459 = vmatprep.subr.mxu1 %v2896_v0  ;;  %v660_v26 = vsel %vm659_vm1, %v3509_v30, %v658_v55  ;;  %1750 = vadd.xlane.f32.xlu1 %v1749_v42  ;;  %v667_v30 = vsel %vm666_vm3, %v3523_v46, %v665_v40  ;;  %v1673_v12 = vmul.f32 %v2519_v29, %v2519_v29  ;;  %v3790_v46 = vld [vmem:[%s5133_s1 + $0x108] sm:$0xff] }
 0x138   :  { %v792_v57 = vmul.f32 %v642_v19, %v335_v7  ;;  %2492 = vmatprep.mubr.msk.f32.mxu1 %vm933_vm6, %v890_v41  ;;  %v891_v31 = vmul.f32 %v841_v53, %v791_v47  ;;  %v1721_v3 = vadd.f32 %v1696_v50, %v1671_v61  ;;  %v845_v41 = vld [vmem:[%s5136_s3 + $0x60] sm:$0xff]  ;;  %v3728_v47 = vpop.xlane.xlu0 %576  ;;  %v670_v42 = vsel %vm668_vm5, %v669_v58, %v667_v30  ;;  %v3824_v58 = vpop.xlane.xlu1 %585 }
 0x139   :  { %v339_v9 = vpop.f32.mrf.mxu0  ;;  %1089 = vmatmul.mubr.f32.gmra.mxu1 %v889_v44  ;;  %v2518_v44 = vld [vmem:[%s5134_s0 + $0xe8] sm:$0xff]  ;;  %2818 = vrsqrt.f32 %v3728_v47  ;;  %v679_v61 = vmul.f32 %v2811_v60, %v3586_v54  ;;  %v686_v40 = vmul.f32 %v2813_v15, %v3613_v18  ;;  %vm708_vm1 = vcmp.eq.f32.partialorder %v3728_v47, inf }
 0x13a   :  { %v892_v62 = vmul.f32 %v842_v48, %v792_v57  ;;  %2592 = vmatpush1.xpose.msk.msra.mxu1 %vm92_vm0, %v3634_v22  ;;  %v793_v10 = vmul.f32 %v649_v21, %v339_v9  ;;  %v1752_v48 = vsel %vm92_vm0, %v1721_v3, 0.0  ;;  %v1672_v51 = vmul.f32 %v2518_v44, %v2518_v44  ;;  %v3804_v3 = vld [vmem:[%s5133_s1 + $0xf8] sm:$0xff] }
 0x13b   :  { %v341_v11 = vpop.f32.mrf.mxu0  ;;  %1461 = vmatprep.subr.mxu1 %v2896_v0  ;;  %v663_v57 = vsel %vm661_vm2, %v662_v36, %v660_v26  ;;  %1753 = vadd.xlane.f32.xlu0 %v1752_v48  ;;  %2820 = vrsqrt.f32 %v3740_v13  ;;  %v850_v26 = vld [vmem:[%s5136_s3 + $0x88] sm:$0xff]  ;;  %vm715_vm2 = vcmp.eq.f32.partialorder %v3740_v13, inf  ;;  %vm717_vm5 = vcmp.eq.f32.partialorder %v3740_v13, 0.0 }
 0x13c   :  { %v794_v24 = vmul.f32 %v649_v21, %v341_v11  ;;  %2493 = vmatprep.mubr.msk.f32.mxu1 %vm933_vm6, %v892_v62  ;;  %v893_v28 = vmul.f32 %v843_v20, %v793_v10  ;;  %v848_v62 = vld [vmem:[%s5136_s3 + $0x78] sm:$0xff]  ;;  %v3752_v21 = vld [vmem:[%s5133_s1 + $0x110] sm:$0xff]  ;;  %v1722_v55 = vadd.f32 %v1697_v52, %v1672_v51  ;;  %v674_v10 = vsel %vm673_vm4, %v3540_v59, %v672_v43  ;;  %v3771_v20 = vpop.xlane.xlu0 %582 }
 0x13d   :  { %v345_v23 = vpop.f32.mrf.mxu0  ;;  %1094 = vmatmul.mubr.f32.gmra.mxu1 %v891_v31  ;;  %v676_v11 = vand.u32 2147483648, %v3540_v59  ;;  %2822 = vrsqrt.f32 %v3771_v20  ;;  %v681_v51 = vsel %vm680_vm8, %v3586_v54, %v679_v61  ;;  %v683_v52 = vand.u32 2147483648, %v3586_v54 }
 0x13e   :  { %v894_v56 = vmul.f32 %v844_v33, %v794_v24  ;;  %2593 = vmatpush1.xpose.msk.msra.mxu1 %vm92_vm0, %v3676_v14  ;;  %v795_v37 = vmul.f32 %v656_v25, %v345_v23  ;;  %v3766_v33 = vld [vmem:[%s5133_s1 + $0xf0] sm:$0xff]  ;;  %v1755_v36 = vsel %vm92_vm0, %v1722_v55, 0.0  ;;  %2824 = vrsqrt.f32 %v3824_v58 }
 0x13f   :  { %v347_v38 = vpop.f32.mrf.mxu0  ;;  %1463 = vmatprep.subr.mxu1 %v2896_v0  ;;  %v1698_v34 = vmul.f32 %v3766_v33, %v3766_v33  ;;  %1756 = vadd.xlane.f32.xlu1 %v1755_v36  ;;  %v851_v55 = vld [vmem:[%s5136_s3 + $0x90] sm:$0xff]  ;;  %vm722_vm3 = vcmp.eq.f32.partialorder %v3771_v20, inf  ;;  %vm710_vm4 = vcmp.eq.f32.partialorder %v3728_v47, 0.0  ;;  %vm729_vm8 = vcmp.eq.f32.partialorder %v3824_v58, inf }
 0x140   :  { %v796_v19 = vmul.f32 %v656_v25, %v347_v38  ;;  %2494 = vmatprep.mubr.msk.f32.mxu1 %vm933_vm6, %v894_v56  ;;  %v895_v9 = vmul.f32 %v845_v41, %v795_v37  ;;  %v849_v37 = vld [vmem:[%s5136_s3 + $0x80] sm:$0xff]  ;;  %v3809_v41 = vld [vmem:[%s5134_s0 + $0xf8] sm:$0xff]  ;;  %v3857_v61 = vpop.xlane.xlu0 %588 }
 0x141   :  { %v351_v7 = vpop.f32.mrf.mxu0  ;;  %1099 = vmatmul.mubr.f32.gmra.mxu1 %v893_v28  ;;  %v1723_v28 = vadd.f32 %v1698_v34, %v1673_v12  ;;  %v1674_v44 = vmul.f32 %v3809_v41, %v3809_v41  ;;  %v684_v34 = vsel %vm682_vm10, %v683_v52, %v681_v51  ;;  %2826 = vrsqrt.f32 %v3857_v61 }
 0x142   :  { %v896_v53 = vmul.f32 %v846_v39, %v796_v19  ;;  %2594 = vmatpush1.xpose.msk.msra.mxu1 %vm92_vm0, %v3711_v63  ;;  %v797_v16 = vmul.f32 %v663_v57, %v351_v7  ;;  %v677_v39 = vsel %vm675_vm7, %v676_v11, %v674_v10  ;;  %v2815_v19 = vpop.eup %2814  ;;  %v1699_v7 = vmul.f32 %v3804_v3, %v3804_v3  ;;  %v3846_v11 = vld [vmem:[%s5134_s0 + $0x100] sm:$0xff] }
 0x143   :  { %v353_v17 = vpop.f32.mrf.mxu0  ;;  %1465 = vmatprep.subr.mxu1 %v2896_v0  ;;  %v1758_v59 = vsel %vm92_vm0, %v1723_v28, 0.0  ;;  %v693_v10 = vmul.f32 %v2815_v19, %v3652_v8  ;;  %v704_v52 = vand.u32 2147483648, %v3664_v1  ;;  %vm724_vm7 = vcmp.eq.f32.partialorder %v3771_v20, 0.0 }
 0x144   :  { %v798_v31 = vmul.f32 %v663_v57, %v353_v17  ;;  %2495 = vmatprep.mubr.msk.f32.mxu1 %vm933_vm6, %v896_v53  ;;  %v897_v50 = vmul.f32 %v847_v27, %v797_v16  ;;  %1759 = vadd.xlane.f32.xlu0 %v1758_v59  ;;  %v2817_v53 = vpop.eup %2816  ;;  %v852_v16 = vld [vmem:[%s5136_s3 + $0x98] sm:$0xff]  ;;  %v2546_v17 = vld [vmem:[%s5133_s1 + $0x100] sm:$0xff]  ;;  %v1724_v30 = vadd.f32 %v1699_v7, %v1674_v44  ;;  %vm736_vm10 = vcmp.eq.f32.partialorder %v3857_v61, inf }
 0x145   :  { %v357_v24 = vpop.f32.mrf.mxu0  ;;  %1104 = vmatmul.mubr.f32.gmra.mxu1 %v895_v9  ;;  %v1700_v36 = vmul.f32 %v2546_v17, %v2546_v17  ;;  %v1701_v7 = vmul.f32 %v3790_v46, %v3790_v46 }
 0x146   :  { %v898_v23 = vmul.f32 %v848_v62, %v798_v31  ;;  %2595 = vmatpush1.xpose.msk.msra.mxu1 %vm92_vm0, %v3752_v21  ;;  %v799_v56 = vmul.f32 %v670_v42, %v357_v24  ;;  %v690_v62 = vand.u32 2147483648, %v3613_v18  ;;  %v688_v31 = vsel %vm687_vm9, %v3613_v18, %v686_v40  ;;  %v3877_v40 = vld [vmem:[%s5134_s0 + $0x108] sm:$0xff]  ;;  %v2819_v19 = vpop.eup %2818 }
 0x147   :  { %v359_v25 = vpop.f32.mrf.mxu0  ;;  %1467 = vmatprep.subr.mxu1 %v2896_v0  ;;  %v1761_v15 = vsel %vm92_vm0, %v1724_v30, 0.0  ;;  %v1675_v24 = vmul.f32 %v3846_v11, %v3846_v11  ;;  %v1676_v44 = vmul.f32 %v3877_v40, %v3877_v40  ;;  %vm731_vm9 = vcmp.eq.f32.partialorder %v3824_v58, 0.0 }
 0x148   :  { %v800_v38 = vmul.f32 %v670_v42, %v359_v25  ;;  %2496 = vmatprep.mubr.msk.f32.mxu1 %vm933_vm6, %v898_v23  ;;  %v899_v57 = vmul.f32 %v849_v37, %v799_v56  ;;  %v700_v23 = vmul.f32 %v2817_v53, %v3664_v1  ;;  %1762 = vadd.xlane.f32.xlu1 %v1761_v15  ;;  %v854_v25 = vld [vmem:[%s5136_s3 + $0xa8] sm:$0xff]  ;;  %v2821_v53 = vpop.eup %2820 }
 0x149   :  { %v363_v43 = vpop.f32.mrf.mxu0  ;;  %1109 = vmatmul.mubr.f32.gmra.mxu1 %v897_v50  ;;  %v1725_v54 = vadd.f32 %v1700_v36, %v1675_v24  ;;  %v691_v37 = vsel %vm689_vm11, %v690_v62, %v688_v31 }
 0x14a   :  { %v900_v48 = vmul.f32 %v850_v26, %v800_v38  ;;  %2596 = vmatpush1.xpose.msk.msra.mxu1 %vm92_vm0, %v3790_v46  ;;  %v801_v60 = vmul.f32 %v677_v39, %v363_v43  ;;  %v853_v26 = vld [vmem:[%s5136_s3 + $0xa0] sm:$0xff]  ;;  %v695_v38 = vsel %vm694_vm12, %v3652_v8, %v693_v10  ;;  %v3879_v43 = vpop.xlane.xlu1 %591  ;;  %v702_v51 = vsel %vm701_vm13, %v3664_v1, %v700_v23  ;;  %v856_v46 = vld [vmem:[%s5136_s3 + $0xb8] sm:$0xff]  ;;  %v2823_v31 = vpop.eup %2822 }
 0x14b   :  { %v365_v9 = vpop.f32.mrf.mxu0  ;;  %1469 = vmatprep.subr.mxu1 %v2896_v0  ;;  %v1764_v18 = vsel %vm92_vm0, %v1725_v54, 0.0  ;;  %2828 = vrsqrt.f32 %v3879_v43  ;;  %v705_v36 = vsel %vm703_vm15, %v704_v52, %v702_v51  ;;  %v857_v1 = vld [vmem:[%s5136_s3 + $0xc0] sm:$0xff]  ;;  %v721_v54 = vmul.f32 %v2823_v31, %v3771_v20 }
 0x14c   :  { %v802_v27 = vmul.f32 %v677_v39, %v365_v9  ;;  %2497 = vmatprep.mubr.msk.f32.mxu1 %vm933_vm6, %v900_v48  ;;  %v901_v42 = vmul.f32 %v851_v55, %v801_v60  ;;  %v697_v39 = vand.u32 2147483648, %v3652_v8  ;;  %1765 = vadd.xlane.f32.xlu0 %v1764_v18  ;;  %v707_v55 = vmul.f32 %v2819_v19, %v3728_v47 }
 0x14d   :  { %v369_v29 = vpop.f32.mrf.mxu0  ;;  %1114 = vmatmul.mubr.f32.gmra.mxu1 %v899_v57  ;;  %v1702_v8 = vmul.f32 %v3752_v21, %v3752_v21  ;;  %v1703_v19 = vmul.f32 %v3711_v63, %v3711_v63  ;;  %v860_v63 = vld [vmem:[%s5136_s3 + $0xd8] sm:$0xff]  ;;  %vm743_vm11 = vcmp.eq.f32.partialorder %v3879_v43, inf  ;;  %vm738_vm12 = vcmp.eq.f32.partialorder %v3857_v61, 0.0 }
 0x14e   :  { %v902_v12 = vmul.f32 %v852_v16, %v802_v27  ;;  %2597 = vmatpush1.xpose.msk.msra.mxu1 %vm92_vm0, %v2546_v17  ;;  %v803_v50 = vmul.f32 %v684_v34, %v369_v29  ;;  %v3898_v16 = vpop.xlane.xlu0 %594  ;;  %v855_v17 = vld [vmem:[%s5136_s3 + $0xb0] sm:$0xff]  ;;  %v698_v30 = vsel %vm696_vm14, %v697_v39, %v695_v38  ;;  %vm745_vm14 = vcmp.eq.f32.partialorder %v3879_v43, 0.0 }
 0x14f   :  { %v371_v56 = vpop.f32.mrf.mxu0  ;;  %1471 = vmatprep.subr.mxu1 %v2896_v0  ;;  %v3912_v27 = vld [vmem:[%s5134_s0 + $0x110] sm:$0xff]  ;;  %2830 = vrsqrt.f32 %v3898_v16  ;;  %vm750_vm13 = vcmp.eq.f32.partialorder %v3898_v16, inf  ;;  %vm752_vm15 = vcmp.eq.f32.partialorder %v3898_v16, 0.0 }
 0x150   :  { %v804_v28 = vmul.f32 %v684_v34, %v371_v56  ;;  %2498 = vmatprep.mubr.msk.f32.mxu1 %vm933_vm6, %v902_v12  ;;  %v903_v57 = vmul.f32 %v853_v26, %v803_v50  ;;  %v1677_v15 = vmul.f32 %v3912_v27, %v3912_v27  ;;  %v714_v12 = vmul.f32 %v2821_v53, %v3740_v13  ;;  %v858_v50 = vld [vmem:[%s5136_s3 + $0xc8] sm:$0xff]  ;;  %v3943_v26 = vld [vmem:[%s5134_s0 + $0x118] sm:$0xff]  ;;  %v859_v53 = vld [vmem:[%s5136_s3 + $0xd0] sm:$0xff] }
 0x151   :  { %v375_v59 = vpop.f32.mrf.mxu0  ;;  %1119 = vmatmul.mubr.f32.gmra.mxu1 %v901_v42  ;;  %v709_v56 = vsel %vm708_vm1, %v3728_v47, %v707_v55  ;;  %v1678_v39 = vmul.f32 %v3943_v26, %v3943_v26 }
 0x152   :  { %v904_v48 = vmul.f32 %v854_v25, %v804_v28  ;;  %2598 = vmatpush1.xpose.msk.msra.mxu1 %vm92_vm0, %v3804_v3  ;;  %v805_v60 = vmul.f32 %v691_v37, %v375_v59  ;;  %v1726_v3 = vadd.f32 %v1701_v7, %v1676_v44  ;;  %v1727_v21 = vadd.f32 %v1702_v8, %v1677_v15  ;;  %v3945_v28 = vpop.xlane.xlu1 %597  ;;  %v2825_v7 = vpop.eup %2824 }
 0x153   :  { %v377_v9 = vpop.f32.mrf.mxu0  ;;  %1473 = vmatprep.subr.mxu1 %v2896_v0  ;;  %v711_v25 = vand.u32 2147483648, %v3728_v47  ;;  %v716_v18 = vsel %vm715_vm2, %v3740_v13, %v714_v12  ;;  %v718_v44 = vand.u32 2147483648, %v3740_v13  ;;  %2832 = vrsqrt.f32 %v3945_v28 }
 0x154   :  { %v806_v62 = vmul.f32 %v691_v37, %v377_v9  ;;  %2499 = vmatprep.mubr.msk.f32.mxu1 %vm933_vm6, %v904_v48  ;;  %v1767_v29 = vsel %vm92_vm0, %v1726_v3, 0.0  ;;  %v905_v34 = vmul.f32 %v855_v17, %v805_v60  ;;  %v1770_v38 = vsel %vm92_vm0, %v1727_v21, 0.0 }
 0x155   :  { %v381_v10 = vpop.f32.mrf.mxu0  ;;  %1124 = vmatmul.mubr.f32.gmra.mxu1 %v903_v57  ;;  %1768 = vadd.xlane.f32.xlu1 %v1767_v29  ;;  %v723_v60 = vsel %vm722_vm3, %v3771_v20, %v721_v54  ;;  %v725_v9 = vand.u32 2147483648, %v3771_v20  ;;  %v712_v31 = vsel %vm710_vm4, %v711_v25, %v709_v56  ;;  %v2827_v29 = vpop.eup %2826  ;;  %v719_v12 = vsel %vm717_vm5, %v718_v44, %v716_v18 }
 0x156   :  { %v906_v24 = vmul.f32 %v856_v46, %v806_v62  ;;  %2599 = vmatpush1.xpose.msk.msra.mxu1 %vm92_vm0, %v3766_v33  ;;  %v807_v23 = vmul.f32 %v698_v30, %v381_v10  ;;  %1771 = vadd.xlane.f32.xlu0 %v1770_v38  ;;  %v3977_v46 = vld [vmem:[%s5134_s0 + $0x120] sm:$0xff]  ;;  %v728_v10 = vmul.f32 %v2825_v7, %v3824_v58  ;;  %v739_v44 = vand.u32 2147483648, %v3857_v61 }
 0x157   :  { %v383_v42 = vpop.f32.mrf.mxu0  ;;  %1475 = vmatprep.subr.mxu1 %v2896_v0  ;;  %v1679_v62 = vmul.f32 %v3977_v46, %v3977_v46  ;;  %v1705_v20 = vmul.f32 %v3634_v22, %v3634_v22  ;;  %v735_v54 = vmul.f32 %v2827_v29, %v3857_v61  ;;  %v864_v22 = vld [vmem:[%s5136_s3 + $0xf8] sm:$0xff]  ;;  %vm757_vm1 = vcmp.eq.f32.partialorder %v3945_v28, inf }
 0x158   :  { %v808_v33 = vmul.f32 %v698_v30, %v383_v42  ;;  %2500 = vmatprep.mubr.msk.f32.mxu1 %vm933_vm6, %v906_v24  ;;  %v907_v48 = vmul.f32 %v857_v1, %v807_v23  ;;  %v1704_v30 = vmul.f32 %v3676_v14, %v3676_v14  ;;  %v4006_v23 = vld [vmem:[%s5134_s0 + $0x128] sm:$0xff]  ;;  %v2829_v42 = vpop.eup %2828  ;;  %v732_v1 = vand.u32 2147483648, %v3824_v58  ;;  %v4072_v29 = vld [vmem:[%s5134_s0 + $0x138] sm:$0xff] }
 0x159   :  { %v387_v37 = vpop.f32.mrf.mxu0  ;;  %1129 = vmatmul.mubr.f32.gmra.mxu1 %v905_v34  ;;  %v726_v34 = vsel %vm724_vm7, %v725_v9, %v723_v60  ;;  %v1680_v13 = vmul.f32 %v4006_v23, %v4006_v23  ;;  %v730_v25 = vsel %vm729_vm8, %v3824_v58, %v728_v10  ;;  %v742_v7 = vmul.f32 %v2829_v42, %v3879_v43 }
 0x15a   :  { %v908_v59 = vmul.f32 %v858_v50, %v808_v33  ;;  %2600 = vmatpush1.xpose.msk.msra.mxu1 %vm92_vm0, %v3723_v2  ;;  %v809_v51 = vmul.f32 %v705_v36, %v387_v37  ;;  %v1728_v2 = vadd.f32 %v1703_v19, %v1678_v39  ;;  %v1729_v14 = vadd.f32 %v1704_v30, %v1679_v62  ;;  %v4008_v50 = vpop.xlane.xlu0 %600  ;;  %v865_v30 = vld [vmem:[%s5136_s3 + $0x100] sm:$0xff] }
 0x15b   :  { %v389_v52 = vpop.f32.mrf.mxu0  ;;  %1477 = vmatprep.subr.mxu1 %v2896_v0  ;;  %2834 = vrsqrt.f32 %v4008_v50  ;;  %v737_v60 = vsel %vm736_vm10, %v3857_v61, %v735_v54  ;;  %v746_v10 = vand.u32 2147483648, %v3879_v43  ;;  %vm759_vm2 = vcmp.eq.f32.partialorder %v3945_v28, 0.0 }
 0x15c   :  { %v810_v57 = vmul.f32 %v705_v36, %v389_v52  ;;  %2501 = vmatprep.mubr.msk.f32.mxu1 %vm933_vm6, %v908_v59  ;;  %v1773_v17 = vsel %vm92_vm0, %v1728_v2, 0.0  ;;  %v909_v15 = vmul.f32 %v859_v53, %v809_v51  ;;  %v862_v36 = vld [vmem:[%s5136_s3 + $0xe8] sm:$0xff]  ;;  %v1776_v33 = vsel %vm92_vm0, %v1729_v14, 0.0  ;;  %v2831_v37 = vpop.eup %2830  ;;  %v863_v59 = vld [vmem:[%s5136_s3 + $0xf0] sm:$0xff]  ;;  %v4040_v51 = vpop.xlane.xlu1 %603 }
 0x15d   :  { %v393_v3 = vpop.f32.mrf.mxu0  ;;  %1134 = vmatmul.mubr.f32.gmra.mxu1 %v907_v48  ;;  %1774 = vadd.xlane.f32.xlu1 %v1773_v17  ;;  %v4038_v48 = vld [vmem:[%s5134_s0 + $0x130] sm:$0xff]  ;;  %v1706_v53 = vmul.f32 %v3598_v6, %v3598_v6  ;;  %v749_v9 = vmul.f32 %v2831_v37, %v3898_v16  ;;  %v866_v6 = vld [vmem:[%s5136_s3 + $0x108] sm:$0xff]  ;;  %2836 = vrsqrt.f32 %v4040_v51  ;;  %v1707_v14 = vmul.f32 %v3559_v49, %v3559_v49  ;;  %v868_v49 = vld [vmem:[%s5136_s3 + $0x118] sm:$0xff] }
 0x15e   :  { %v910_v55 = vmul.f32 %v860_v63, %v810_v57  ;;  %2601 = vmatpush1.xpose.msk.msra.mxu1 %vm92_vm0, %v3687_v45  ;;  %v811_v8 = vmul.f32 %v712_v31, %v393_v3  ;;  %v861_v45 = vld [vmem:[%s5136_s3 + $0xe0] sm:$0xff]  ;;  %1777 = vadd.xlane.f32.xlu0 %v1776_v33  ;;  %v1681_v2 = vmul.f32 %v4038_v48, %v4038_v48  ;;  %v4088_v42 = vpop.xlane.xlu0 %606  ;;  %vm764_vm3 = vcmp.eq.f32.partialorder %v4008_v50, inf }
 0x15f   :  { %v395_v24 = vpop.f32.mrf.mxu0  ;;  %1479 = vmatprep.subr.mxu1 %v2896_v0  ;;  %v4112_v37 = vld [vmem:[%s5134_s0 + $0x140] sm:$0xff]  ;;  %2838 = vrsqrt.f32 %v4088_v42  ;;  %vm766_vm4 = vcmp.eq.f32.partialorder %v4008_v50, 0.0  ;;  %vm771_vm5 = vcmp.eq.f32.partialorder %v4040_v51, inf  ;;  %vm773_vm7 = vcmp.eq.f32.partialorder %v4040_v51, 0.0 }
 0x160   :  { %v812_v47 = vmul.f32 %v712_v31, %v395_v24  ;;  %2502 = vmatprep.mubr.msk.f32.mxu1 %vm933_vm6, %v910_v55  ;;  %v911_v38 = vmul.f32 %v861_v45, %v811_v8  ;;  %v744_v31 = vsel %vm743_vm11, %v3879_v43, %v742_v7  ;;  %v1683_v61 = vmul.f32 %v4112_v37, %v4112_v37 }
 0x161   :  { %v399_v21 = vpop.f32.mrf.mxu0  ;;  %1139 = vmatmul.mubr.f32.gmra.mxu1 %v909_v15  ;;  %v2833_v15 = vpop.eup %2832  ;;  %v1708_v43 = vmul.f32 %v3532_v4, %v3532_v4  ;;  %v4135_v4 = vld [vmem:[%s5134_s0 + $0x160] sm:$0xff]  ;;  %vm778_vm8 = vcmp.eq.f32.partialorder %v4088_v42, inf  ;;  %vm1199_vm10 = vcmask 162816  }
 0x162   :  { %v912_v56 = vmul.f32 %v862_v36, %v812_v47  ;;  %2602 = vmatpush1.xpose.msk.msra.mxu1 %vm92_vm0, %v3647_v5  ;;  %v813_v39 = vmul.f32 %v719_v12, %v399_v21  ;;  %v1730_v5 = vadd.f32 %v1705_v20, %v1680_v13  ;;  %v1682_v36 = vmul.f32 %v4072_v29, %v4072_v29 }
 0x163   :  { %v401_v19 = vpop.f32.mrf.mxu0  ;;  %1481 = vmatprep.subr.mxu1 %v2896_v0  ;;  %v733_v47 = vsel %vm731_vm9, %v732_v1, %v730_v25  ;;  %v867_v1 = vld [vmem:[%s5136_s3 + $0x110] sm:$0xff]  ;;  %v747_v25 = vsel %vm745_vm14, %v746_v10, %v744_v31  ;;  %v756_v54 = vmul.f32 %v2833_v15, %v3945_v28  ;;  %vm780_vm9 = vcmp.eq.f32.partialorder %v4088_v42, 0.0 }
 0x164   :  { %v814_v18 = vmul.f32 %v719_v12, %v401_v19  ;;  %2503 = vmatprep.mubr.msk.f32.mxu1 %vm933_vm6, %v912_v56  ;;  %v1779_v63 = vsel %vm92_vm0, %v1730_v5, 0.0  ;;  %v913_v3 = vmul.f32 %v863_v59, %v813_v39  ;;  %v751_v12 = vsel %vm750_vm13, %v3898_v16, %v749_v9  ;;  %v4130_v59 = vld [vmem:[%s5133_s1 + $0x160] sm:$0xff] }
 0x165   :  { %v405_v52 = vpop.f32.mrf.mxu0  ;;  %1144 = vmatmul.mubr.f32.gmra.mxu1 %v911_v38  ;;  %1780 = vadd.xlane.f32.xlu1 %v1779_v63  ;;  %v1732_v58 = vadd.f32 %v1707_v14, %v1682_v36  ;;  %v740_v56 = vsel %vm738_vm12, %v739_v44, %v737_v60  ;;  %v869_v44 = vld [vmem:[%s5136_s3 + $0x120] sm:$0xff]  ;;  %v1733_v63 = vadd.f32 %v1708_v43, %v1683_v61  ;;  %v760_v9 = vand.u32 2147483648, %v3945_v28  ;;  %v4184_v36 = vld [vmem:[%s5134_s0 + $0x168] sm:$0xff]  ;;  %v871_v14 = vld [vmem:[%s5136_s3 + $0x130] sm:$0xff] }
 0x166   :  { %v914_v57 = vmul.f32 %v864_v22, %v814_v18  ;;  %2603 = vmatpush1.xpose.msk.msra.mxu1 %vm92_vm0, %v3608_v35  ;;  %v815_v17 = vmul.f32 %v726_v34, %v405_v52  ;;  %v1731_v35 = vadd.f32 %v1706_v53, %v1681_v2  ;;  %v4147_v52 = vld [vmem:[%s5133_s1 + $0x180] sm:$0xff]  ;;  %v1687_v2 = vmul.f32 %v4135_v4, %v4135_v4 }
 0x167   :  { %v407_v62 = vpop.f32.mrf.mxu0  ;;  %1483 = vmatprep.subr.mxu1 %v2896_v0  ;;  %v1785_v39 = vsel %vm92_vm0, %v1732_v58, 0.0  ;;  %v1712_v53 = vmul.f32 %v4130_v59, %v4130_v59  ;;  %v758_v60 = vsel %vm757_vm1, %v3945_v28, %v756_v54 }
 0x168   :  { %v816_v55 = vmul.f32 %v726_v34, %v407_v62  ;;  %2504 = vmatprep.mubr.msk.f32.mxu1 %vm933_vm6, %v914_v57  ;;  %v1782_v24 = vsel %vm92_vm0, %v1731_v35, 0.0  ;;  %v753_v34 = vand.u32 2147483648, %v3898_v16  ;;  %v915_v21 = vmul.f32 %v865_v30, %v815_v17  ;;  %v870_v16 = vld [vmem:[%s5136_s3 + $0x128] sm:$0xff]  ;;  %v2835_v62 = vpop.eup %2834 }
 0x169   :  { %v411_v8 = vpop.f32.mrf.mxu0  ;;  %1149 = vmatmul.mubr.f32.gmra.mxu1 %v913_v3  ;;  %1783 = vadd.xlane.f32.xlu0 %v1782_v24  ;;  %v4162_v3 = vld [vmem:[%s5133_s1 + $0x148] sm:$0xff]  ;;  %v1788_v35 = vsel %vm92_vm0, %v1733_v63, 0.0  ;;  %v1737_v30 = vadd.f32 %v1712_v53, %v1687_v2  ;;  %v761_v58 = vsel %vm759_vm2, %v760_v9, %v758_v60 }
 0x16a   :  { %v916_v45 = vmul.f32 %v866_v6, %v816_v55  ;;  %2604 = vmatpush1.xpose.msk.msra.mxu1 %vm92_vm0, %v3571_v32  ;;  %v817_v33 = vmul.f32 %v733_v47, %v411_v8  ;;  %v4097_v32 = vld [vmem:[%s5133_s1 + $0x188] sm:$0xff]  ;;  %v4125_v5 = vsel %vm752_vm15, %v753_v34, %v751_v12  ;;  %v1709_v31 = vmul.f32 %v4162_v3, %v4162_v3  ;;  %v4196_v12 = vld [vmem:[%s5133_s1 + $0x178] sm:$0xff] }
 0x16b   :  { %v413_v13 = vpop.f32.mrf.mxu0  ;;  %1499 = vmatprep.subr.mxu1 %v2896_v0  ;;  %v4167_v17 = vld [vmem:[%s5134_s0 + $0x148] sm:$0xff]  ;;  %v1800_v34 = vsel %vm92_vm0, %v1737_v30, 0.0  ;;  %v4255_v30 = vld [vmem:[%s5133_s1 + $0x158] sm:$0xff] }
 0x16c   :  { %v818_v20 = vmul.f32 %v733_v47, %v413_v13  ;;  %2505 = vmatprep.mubr.msk.f32.mxu1 %vm933_vm6, %v916_v45  ;;  %v917_v18 = vmul.f32 %v867_v1, %v817_v33  ;;  %v1684_v55 = vmul.f32 %v4167_v17, %v4167_v17  ;;  %v4179_v24 = vld [vmem:[%s5133_s1 + $0x168] sm:$0xff]  ;;  %v872_v47 = vld [vmem:[%s5136_s3 + $0x138] sm:$0xff]  ;;  %v1688_v33 = vmul.f32 %v4184_v36, %v4184_v36 }
 0x16d   :  { %v417_v38 = vpop.f32.mrf.mxu0  ;;  %1154 = vmatmul.mubr.f32.gmra.mxu1 %v915_v21  ;;  %1786 = vadd.xlane.f32.xlu0 %v1785_v39  ;;  %v1713_v13 = vmul.f32 %v4179_v24, %v4179_v24  ;;  %v763_v1 = vmul.f32 %v2835_v62, %v4008_v50  ;;  %v874_v2 = vld [vmem:[%s5136_s3 + $0x148] sm:$0xff] }
 0x16e   :  { %v918_v19 = vmul.f32 %v868_v49, %v818_v20  ;;  %v819_v22 = vmul.f32 %v740_v56, %v417_v38  ;;  %2605 = vmatpush2.xpose.msk.msra.mxu1 %vm92_vm0, %v4097_v32  ;;  %v1734_v21 = vadd.f32 %v1709_v31, %v1684_v55  ;;  %v4211_v20 = vld [vmem:[%s5133_s1 + $0x150] sm:$0xff]  ;;  %1801 = vadd.xlane.f32.xlu1 %v1800_v34  ;;  %v4260_v55 = vld [vmem:[%s5134_s0 + $0x158] sm:$0xff] }
 0x16f   :  { %v419_v7 = vpop.f32.mrf.mxu0  ;;  %1501 = vmatprep.subr.mxu1 %v2896_v0  ;;  %v1738_v38 = vadd.f32 %v1713_v13, %v1688_v33  ;;  %v1710_v61 = vmul.f32 %v4211_v20, %v4211_v20  ;;  %v4272_v34 = vld [vmem:[%s5134_s0 + $0x178] sm:$0xff] }
 0x170   :  { %v820_v57 = vmul.f32 %v740_v56, %v419_v7  ;;  %2506 = vmatprep.mubr.msk.f32.mxu1 %vm933_vm6, %v918_v19  ;;  %v919_v10 = vmul.f32 %v869_v44, %v819_v22  ;;  %v4216_v56 = vld [vmem:[%s5134_s0 + $0x150] sm:$0xff]  ;;  %v1791_v28 = vsel %vm92_vm0, %v1734_v21, 0.0  ;;  %v767_v44 = vand.u32 2147483648, %v4008_v50  ;;  %v876_v13 = vld [vmem:[%s5136_s3 + $0x158] sm:$0xff] }
 0x171   :  { %v423_v6 = vpop.f32.mrf.mxu0  ;;  %1159 = vmatmul.mubr.f32.gmra.mxu1 %v917_v18  ;;  %1789 = vadd.xlane.f32.xlu0 %v1788_v35  ;;  %v1685_v39 = vmul.f32 %v4216_v56, %v4216_v56  ;;  %v2560_v18 = vld [vmem:[%s5133_s1 + $0x170] sm:$0xff]  ;;  %v1803_v53 = vsel %vm92_vm0, %v1738_v38, 0.0 }
 0x172   :  { %v920_v15 = vmul.f32 %v870_v16, %v820_v57  ;;  %v821_v8 = vmul.f32 %v747_v25, %v423_v6  ;;  %2606 = vmatpush2.xpose.msk.msra.mxu1 %vm92_vm0, %v4147_v52  ;;  %v4233_v7 = vld [vmem:[%s5134_s0 + $0x170] sm:$0xff]  ;;  %v873_v16 = vld [vmem:[%s5136_s3 + $0x140] sm:$0xff]  ;;  %v1714_v9 = vmul.f32 %v2560_v18, %v2560_v18  ;;  %v765_v6 = vsel %vm764_vm3, %v4008_v50, %v763_v1 }
 0x173   :  { %v425_v45 = vpop.f32.mrf.mxu0  ;;  %1503 = vmatprep.subr.mxu1 %v2896_v0  ;;  %v1735_v57 = vadd.f32 %v1710_v61, %v1685_v39  ;;  %v1689_v60 = vmul.f32 %v4233_v7, %v4233_v7  ;;  %1804 = vadd.xlane.f32.xlu1 %v1803_v53  ;;  %v768_v39 = vsel %vm766_vm4, %v767_v44, %v765_v6  ;;  %v774_v61 = vand.u32 2147483648, %v4040_v51  ;;  %v4302_v44 = vld [vmem:[%s5134_s0 + $0x180] sm:$0xff] }
 0x174   :  { %v822_v49 = vmul.f32 %v747_v25, %v425_v45  ;;  %2507 = vmatprep.mubr.msk.f32.mxu1 %vm933_vm6, %v920_v15  ;;  %v2837_v25 = vpop.eup %2836  ;;  %v921_v43 = vmul.f32 %v871_v14, %v821_v8  ;;  %v1686_v15 = vmul.f32 %v4260_v55, %v4260_v55  ;;  %v1711_v8 = vmul.f32 %v4255_v30, %v4255_v30 }
 0x175   :  { %v429_v54 = vpop.f32.mrf.mxu0  ;;  %1164 = vmatmul.mubr.f32.gmra.mxu1 %v919_v10  ;;  %1792 = vadd.xlane.f32.xlu0 %v1791_v28  ;;  %v770_v35 = vmul.f32 %v2837_v25, %v4040_v51  ;;  %v1794_v31 = vsel %vm92_vm0, %v1735_v57, 0.0  ;;  %v1739_v10 = vadd.f32 %v1714_v9, %v1689_v60  ;;  %v2839_v21 = vpop.eup %2838  ;;  %v1690_v25 = vmul.f32 %v4272_v34, %v4272_v34  ;;  %v875_v28 = vld [vmem:[%s5136_s3 + $0x150] sm:$0xff] }
 0x176   :  { %v922_v19 = vmul.f32 %v872_v47, %v822_v49  ;;  %v823_v22 = vmul.f32 %v4125_v5, %v429_v54  ;;  %2607 = vmatpush2.xpose.msk.msra.mxu1 %vm92_vm0, %v4196_v12  ;;  %v1736_v1 = vadd.f32 %v1711_v8, %v1686_v15  ;;  %v1715_v54 = vmul.f32 %v4196_v12, %v4196_v12 }
 0x177   :  { %v431_v63 = vpop.f32.mrf.mxu0  ;;  %1505 = vmatprep.subr.mxu1 %v2896_v0  ;;  %v1806_v49 = vsel %vm92_vm0, %v1739_v10, 0.0  ;;  %v777_v50 = vmul.f32 %v2839_v21, %v4088_v42  ;;  %v1691_v57 = vmul.f32 %v4302_v44, %v4302_v44  ;;  %v1716_v60 = vmul.f32 %v4147_v52, %v4147_v52  ;;  %v879_v21 = vld [vmem:[%s5136_s3 + $0x170] sm:$0xff] }
 0x178   :  { %v824_v62 = vmul.f32 %v4125_v5, %v431_v63  ;;  %2508 = vmatprep.mubr.msk.f32.mxu1 %vm933_vm6, %v922_v19  ;;  %v923_v14 = vmul.f32 %v873_v16, %v823_v22  ;;  %1807 = vadd.xlane.f32.xlu1 %v1806_v49  ;;  %v772_v19 = vsel %vm771_vm5, %v4040_v51, %v770_v35  ;;  %v1797_v12 = vsel %vm92_vm0, %v1736_v1, 0.0  ;;  %v877_v63 = vld [vmem:[%s5136_s3 + $0x160] sm:$0xff]  ;;  %v4329_v51 = vld [vmem:[%s5134_s0 + $0x188] sm:$0xff] }
 0x179   :  { %v435_v5 = vpop.f32.mrf.mxu0  ;;  %1169 = vmatmul.mubr.f32.gmra.mxu1 %v921_v43  ;;  %1795 = vadd.xlane.f32.xlu0 %v1794_v31  ;;  %v1740_v22 = vadd.f32 %v1715_v54, %v1690_v25  ;;  %v775_v6 = vsel %vm773_vm7, %v774_v61, %v772_v19  ;;  %v781_v35 = vand.u32 2147483648, %v4088_v42  ;;  %v779_v52 = vsel %vm778_vm8, %v4088_v42, %v777_v50  ;;  %v881_v61 = vld [vmem:[%s5136_s3 + $0x180] sm:$0xff] }
 0x17a   :  { %v924_v45 = vmul.f32 %v874_v2, %v824_v62  ;;  %v825_v47 = vmul.f32 %v761_v58, %v435_v5  ;;  %2608 = vmatpush2.xpose.msk.msra.mxu1 %vm92_vm0, %v2560_v18  ;;  %v1741_v5 = vadd.f32 %v1716_v60, %v1691_v57  ;;  %v2579_v19 = vld [vmem:[%s5135_s2 + $0x140] sm:$0xff]  ;;  %v2572_v57 = vld [vmem:[%s5135_s2 + $0x108] sm:$0xff]  ;;  %v2566_v60 = vld [vmem:[%s5135_s2 + $0xd8] sm:$0xff] }
 0x17b   :  { %v437_v33 = vpop.f32.mrf.mxu0  ;;  %1507 = vmatprep.subr.mxu1 %v2896_v0  ;;  %v1809_v53 = vsel %vm92_vm0, %v1740_v22, 0.0  ;;  %v782_v25 = vsel %vm780_vm9, %v781_v35, %v779_v52  ;;  %2220 = vmatpush1.msra.mxu0 %v2579_v19  ;;  %v2577_v22 = vld [vmem:[%s5135_s2 + $0x130] sm:$0xff]  ;;  %v2893_v50 = vld [vmem:[%s5134_s0 + $0xe0] sm:$0xff]  ;;  %v2582_v35 = vld [vmem:[%s5135_s2 + $0x158] sm:$0xff] }
 0x17c   :  { %v826_v38 = vmul.f32 %v761_v58, %v437_v33  ;;  %2509 = vmatprep.mubr.msk.f32.mxu1 %vm933_vm6, %v924_v45  ;;  %v925_v16 = vmul.f32 %v875_v28, %v825_v47  ;;  %1810 = vadd.xlane.f32.xlu1 %v1809_v53  ;;  %v1692_v45 = vmul.f32 %v4329_v51, %v4329_v51  ;;  %v2573_v53 = vld [vmem:[%s5135_s2 + $0x110] sm:$0xff] }
 0x17d   :  { %v441_v43 = vpop.f32.mrf.mxu0  ;;  %1174 = vmatmul.mubr.f32.gmra.mxu1 %v923_v14  ;;  %1798 = vadd.xlane.f32.xlu0 %v1797_v12  ;;  %v880_v14 = vld [vmem:[%s5136_s3 + $0x178] sm:$0xff]  ;;  %v1717_v47 = vmul.f32 %v4097_v32, %v4097_v32  ;;  %v2891_v12 = vld [vmem:[%s5134_s0 + $0xd0] sm:$0xff] }
 0x17e   :  { %v926_v58 = vmul.f32 %v876_v13, %v826_v38  ;;  %v827_v18 = vmul.f32 %v768_v39, %v441_v43  ;;  %2609 = vmatpush2.xpose.msk.msra.mxu1 %vm92_vm0, %v4179_v24  ;;  %v878_v24 = vld [vmem:[%s5136_s3 + $0x168] sm:$0xff]  ;;  %2221 = vmatprep.subr.mxu0 %v2896_v0 }
 0x17f   :  { %v443_v2 = vpop.f32.mrf.mxu0  ;;  %1509 = vmatprep.subr.mxu1 %v2896_v0  ;;  %v1742_v49 = vadd.f32 %v1717_v47, %v1692_v45  ;;  %v882_v38 = vld [vmem:[%s5136_s3 + $0x188] sm:$0xff] }
 0x180   :  { %v828_v9 = vmul.f32 %v768_v39, %v443_v2  ;;  %2510 = vmatprep.mubr.msk.f32.mxu1 %vm933_vm6, %v926_v58  ;;  %v927_v31 = vmul.f32 %v877_v63, %v827_v18  ;;  %v2892_v58 = vld [vmem:[%s5134_s0 + $0xd8] sm:$0xff]  ;;  %v2576_v18 = vld [vmem:[%s5135_s2 + $0x128] sm:$0xff] }
 0x181   :  { %v447_v62 = vpop.f32.mrf.mxu0  ;;  %1179 = vmatmul.mubr.f32.gmra.mxu1 %v925_v16  ;;  %v1815_v39 = vsel %vm92_vm0, %v1742_v49, 0.0  ;;  %v2575_v16 = vld [vmem:[%s5135_s2 + $0x120] sm:$0xff]  ;;  %v2894_v63 = vld [vmem:[%s5134_s0 + $0xe8] sm:$0xff]  ;;  %v2574_v2 = vld [vmem:[%s5135_s2 + $0x118] sm:$0xff] }
 0x182   :  { %v928_v10 = vmul.f32 %v878_v24, %v828_v9  ;;  %2610 = vmatpush2.xpose.msk.msra.mxu1 %vm92_vm0, %v4130_v59  ;;  %v829_v15 = vmul.f32 %v775_v6, %v447_v62  ;;  %v1812_v59 = vsel %vm92_vm0, %v1741_v5, 0.0  ;;  %v2895_v24 = vld [vmem:[%s5134_s0 + $0xf0] sm:$0xff]  ;;  %v2588_v9 = vld [vmem:[%s5135_s2 + $0x188] sm:$0xff]  ;;  %v2586_v62 = vld [vmem:[%s5135_s2 + $0x178] sm:$0xff] }
 0x183   :  { %v449_v8 = vpop.f32.mrf.mxu0  ;;  %1511 = vmatprep.subr.mxu1 %v2896_v0  ;;  %1813 = vadd.xlane.f32.xlu1 %v1812_v59  ;;  %v2580_v5 = vld [vmem:[%s5135_s2 + $0x148] sm:$0xff] }
 0x184   :  { %v830_v33 = vmul.f32 %v775_v6, %v449_v8  ;;  %2511 = vmatprep.mubr.msk.f32.mxu1 %vm933_vm6, %v928_v10  ;;  %v929_v54 = vmul.f32 %v879_v21, %v829_v15  ;;  %v2584_v6 = vld [vmem:[%s5135_s2 + $0x168] sm:$0xff] }
 0x185   :  { %v453_v13 = vpop.f32.mrf.mxu0  ;;  %1184 = vmatmul.mubr.f32.gmra.mxu1 %v927_v31 }
 0x186   :  { %v930_v1 = vmul.f32 %v880_v14, %v830_v33  ;;  %2611 = vmatpush2.xpose.msk.msra.mxu1 %vm92_vm0, %v4255_v30  ;;  %v831_v32 = vmul.f32 %v782_v25, %v453_v13 }
 0x187   :  { %v455_v28 = vpop.f32.mrf.mxu0  ;;  %1513 = vmatprep.subr.mxu1 %v2896_v0  ;;  %1816 = vadd.xlane.f32.xlu1 %v1815_v39 }
 0x188   :  { %v832_v42 = vmul.f32 %v782_v25, %v455_v28  ;;  %2512 = vmatprep.mubr.msk.f32.mxu1 %vm933_vm6, %v930_v1  ;;  %v931_v43 = vmul.f32 %v881_v61, %v831_v32 }
 0x189   :  { %1189 = vmatmul.mubr.f32.gmra.mxu1 %v929_v54 }
 0x18a   :  { %v932_v30 = vmul.f32 %v882_v38, %v832_v42  ;;  %2612 = vmatpush2.xpose.msk.msra.mxu1 %vm92_vm0, %v4211_v20  ;;  %v2890_v20 = vld [vmem:[%s5134_s0 + $0xc8] sm:$0xff] }
 0x18b   :  { %1515 = vmatprep.subr.mxu1 %v2896_v0 }
 0x18c   :  { %2513 = vmatprep.mubr.msk.f32.mxu1 %vm933_vm6, %v932_v30 }
 0x18d   :  { %1194 = vmatmul.mubr.f32.gmra.mxu1 %v931_v43 }
 0x18e   :  { %2613 = vmatpush2.xpose.msk.msra.mxu1 %vm92_vm0, %v4162_v3  ;;  %1517 = vmatprep.mubr.f32.mxu1 %v2896_v0  ;;  %v2578_v3 = vld [vmem:[%s5135_s2 + $0x138] sm:$0xff] }
 0x18f   :  { %2739 = vmatprep.subr.mxu1 %v2896_v0  ;;  %2222 = vmatpush1.msra.mxu0 %v2578_v3 }
 0x190   :  { %2223 = vmatprep.subr.mxu0 %v2896_v0 }
 0x191   :  { %2614 = vmatmul.mubr.msk.f32.vlgmr.msra.gmra.mxu1 %vm92_vm0, %v2890_v20  ;;  %2224 = vmatpush1.msra.mxu0 %v2577_v22 }
 0x192   :  { %1523 = vmatprep.mubr.f32.mxu1 %v2896_v0  ;;  %2764 = vmatpush1.msra.mxu1 %v2579_v19 }
 0x193   :  { %2740 = vmatprep.subr.mxu1 %v2896_v0  ;;  %2225 = vmatprep.subr.mxu0 %v2896_v0 }
 0x194   :  { %2765 = vmatpush1.msra.mxu1 %v2578_v3  ;;  %2226 = vmatpush1.msra.mxu0 %v2576_v18 }
 0x195   :  { %2615 = vmatmul.mubr.msk.f32.gmra.mxu1 %vm92_vm0, %v2891_v12  ;;  %2741 = vmatprep.subr.mxu1 %v2896_v0 }
 0x196   :  { %1529 = vmatprep.mubr.f32.mxu1 %v2896_v0  ;;  %2766 = vmatpush1.msra.mxu1 %v2577_v22  ;;  %v1745_v22 = vpop.xlane.xlu1 %1744 }
 0x197   :  { %2742 = vmatprep.subr.mxu1 %v2896_v0  ;;  %2227 = vmatprep.subr.mxu0 %v2896_v0  ;;  %2840 = vrsqrt.f32 %v1745_v22  ;;  %vm1822_vm11 = vcmp.eq.f32.partialorder %v1745_v22, 0.0 }
 0x198   :  { %2767 = vmatpush1.msra.mxu1 %v2576_v18  ;;  %2228 = vmatpush1.msra.mxu0 %v2575_v16 }
 0x199   :  { %2616 = vmatmul.mubr.msk.f32.gmra.mxu1 %vm92_vm0, %v2892_v58  ;;  %2743 = vmatprep.subr.mxu1 %v2896_v0 }
 0x19a   :  { %1535 = vmatprep.mubr.f32.mxu1 %v2896_v0  ;;  %2768 = vmatpush1.msra.mxu1 %v2575_v16 }
 0x19b   :  { %2229 = vmatprep.subr.mxu0 %v2896_v0  ;;  %2744 = vmatprep.subr.mxu1 %v2896_v0 }
 0x19c   :  { %2230 = vmatpush1.msra.mxu0 %v2574_v2  ;;  %2769 = vmatpush1.msra.mxu1 %v2574_v2 }
 0x19d   :  { %2617 = vmatmul.mubr.msk.f32.gmra.mxu1 %vm92_vm0, %v2893_v50  ;;  %2231 = vmatprep.subr.mxu0 %v2896_v0 }
 0x19e   :  { %1541 = vmatprep.mubr.f32.mxu1 %v2896_v0  ;;  %2745 = vmatprep.subr.mxu1 %v2896_v0 }
 0x19f   :  { %2232 = vmatpush1.msra.mxu0 %v2573_v53  ;;  %2770 = vmatpush1.msra.mxu1 %v2573_v53 }
 0x1a0   :  { %2233 = vmatprep.subr.mxu0 %v2896_v0  ;;  %2746 = vmatprep.subr.mxu1 %v2896_v0 }
 0x1a1   :  { %2618 = vmatmul.mubr.msk.f32.gmra.mxu1 %vm92_vm0, %v2894_v63  ;;  %2234 = vmatpush1.msra.mxu0 %v2572_v57 }
 0x1a2   :  { %1547 = vmatprep.mubr.f32.mxu1 %v2896_v0  ;;  %2771 = vmatpush1.msra.mxu1 %v2572_v57 }
 0x1a3   :  { %2235 = vmatprep.subr.mxu0 %v2896_v0  ;;  %2747 = vmatprep.subr.mxu1 %v2896_v0 }
 0x1a5   :  { %2619 = vmatmul.mubr.msk.f32.gmra.mxu1 %vm92_vm0, %v2895_v24 }
 0x1a6   :  { %1553 = vmatprep.mubr.f32.mxu1 %v2896_v0 }
 0x1a9   :  { %2620 = vmatmul.mubr.msk.f32.gmra.mxu1 %vm92_vm0, %v3809_v41  ;;  %v2571_v41 = vld [vmem:[%s5135_s2 + $0x100] sm:$0xff] }
 0x1aa   :  { %1559 = vmatprep.mubr.f32.mxu1 %v2896_v0  ;;  %2236 = vmatpush1.msra.mxu0 %v2571_v41 }
 0x1ab   :  { %2772 = vmatpush1.msra.mxu1 %v2571_v41  ;;  %2237 = vmatprep.subr.mxu0 %v2896_v0 }
 0x1ac   :  { %2748 = vmatprep.subr.mxu1 %v2896_v0 }
 0x1ad   :  { %2621 = vmatmul.mubr.msk.f32.gmra.mxu1 %vm92_vm0, %v3846_v11  ;;  %v2570_v11 = vld [vmem:[%s5135_s2 + $0xf8] sm:$0xff] }
 0x1ae   :  { %1565 = vmatprep.mubr.f32.mxu1 %v2896_v0  ;;  %2238 = vmatpush1.msra.mxu0 %v2570_v11 }
 0x1af   :  { %2773 = vmatpush1.msra.mxu1 %v2570_v11  ;;  %2239 = vmatprep.subr.mxu0 %v2896_v0 }
 0x1b0   :  { %2749 = vmatprep.subr.mxu1 %v2896_v0 }
 0x1b1   :  { %2622 = vmatmul.mubr.msk.f32.gmra.mxu1 %vm92_vm0, %v3877_v40  ;;  %v2569_v40 = vld [vmem:[%s5135_s2 + $0xf0] sm:$0xff] }
 0x1b2   :  { %1571 = vmatprep.mubr.f32.mxu1 %v2896_v0  ;;  %2240 = vmatpush1.msra.mxu0 %v2569_v40 }
 0x1b3   :  { %2774 = vmatpush1.msra.mxu1 %v2569_v40  ;;  %2241 = vmatprep.subr.mxu0 %v2896_v0  ;;  %v2841_v40 = vpop.eup %2840 }
 0x1b4   :  { %2750 = vmatprep.subr.mxu1 %v2896_v0 }
 0x1b5   :  { %2623 = vmatmul.mubr.msk.f32.gmra.mxu1 %vm92_vm0, %v3912_v27  ;;  %v2568_v27 = vld [vmem:[%s5135_s2 + $0xe8] sm:$0xff] }
 0x1b6   :  { %1577 = vmatprep.mubr.f32.mxu1 %v2896_v0  ;;  %2242 = vmatpush1.msra.mxu0 %v2568_v27 }
 0x1b7   :  { %2775 = vmatpush1.msra.mxu1 %v2568_v27  ;;  %2243 = vmatprep.subr.mxu0 %v2896_v0 }
 0x1b8   :  { %2751 = vmatprep.subr.mxu1 %v2896_v0 }
 0x1b9   :  { %2624 = vmatmul.mubr.msk.f32.gmra.mxu1 %vm92_vm0, %v3943_v26  ;;  %v2567_v26 = vld [vmem:[%s5135_s2 + $0xe0] sm:$0xff] }
 0x1ba   :  { %1583 = vmatprep.mubr.f32.mxu1 %v2896_v0  ;;  %2244 = vmatpush1.msra.mxu0 %v2567_v26  ;;  %v1748_v50 = vpop.xlane.xlu0 %1747 }
 0x1bb   :  { %2776 = vmatpush1.msra.mxu1 %v2567_v26  ;;  %2245 = vmatprep.subr.mxu0 %v2896_v0  ;;  %2842 = vrsqrt.f32 %v1748_v50  ;;  %vm1827_vm12 = vcmp.eq.f32.partialorder %v1748_v50, inf  ;;  %vm1829_vm13 = vcmp.eq.f32.partialorder %v1748_v50, 0.0 }
 0x1bc   :  { %2752 = vmatprep.subr.mxu1 %v2896_v0  ;;  %2246 = vmatpush1.msra.mxu0 %v2566_v60 }
 0x1bd   :  { %2625 = vmatmul.mubr.msk.f32.gmra.mxu1 %vm92_vm0, %v3977_v46  ;;  %2247 = vmatprep.subr.mxu0 %v2896_v0  ;;  %v2565_v46 = vld [vmem:[%s5135_s2 + $0xd0] sm:$0xff] }
 0x1be   :  { %1589 = vmatprep.mubr.f32.mxu1 %v2896_v0  ;;  %2777 = vmatpush1.msra.mxu1 %v2566_v60 }
 0x1bf   :  { %2248 = vmatpush1.msra.mxu0 %v2565_v46  ;;  %2753 = vmatprep.subr.mxu1 %v2896_v0 }
 0x1c0   :  { %2249 = vmatprep.subr.mxu0 %v2896_v0  ;;  %2778 = vmatpush1.msra.mxu1 %v2565_v46  ;;  %v4658_v2 = vpop.xlane.xlu1 %1750  ;;  %v1819_v46 = vmul.f32 %v2841_v40, %v1745_v22 }
 0x1c1   :  { %2626 = vmatmul.mubr.msk.f32.gmra.mxu1 %vm92_vm0, %v4006_v23  ;;  %v2564_v23 = vld [vmem:[%s5135_s2 + $0xc8] sm:$0xff]  ;;  %2754 = vmatprep.subr.mxu1 %v2896_v0  ;;  %2844 = vrsqrt.f32 %v4658_v2  ;;  %vm1834_vm14 = vcmp.eq.f32.partialorder %v4658_v2, inf  ;;  %vm1836_vm15 = vcmp.eq.f32.partialorder %v4658_v2, 0.0 }
 0x1c2   :  { %1595 = vmatprep.mubr.f32.mxu1 %v2896_v0  ;;  %2250 = vmatpush1.msra.mxu0 %v2564_v23 }
 0x1c3   :  { %2265 = vmatprep.subr.mxu0 %v2896_v0  ;;  %2779 = vmatpush1.msra.mxu1 %v2564_v23 }
 0x1c4   :  { %2266 = vmatpush2.msra.mxu0 %v2588_v9  ;;  %2755 = vmatprep.subr.mxu1 %v2896_v0  ;;  %v4665_v57 = vpop.xlane.xlu0 %1753 }
 0x1c5   :  { %2627 = vmatmul.mubr.msk.f32.gmra.mxu1 %vm92_vm0, %v4038_v48  ;;  %2267 = vmatprep.subr.mxu0 %v2896_v0  ;;  %v2587_v48 = vld [vmem:[%s5135_s2 + $0x180] sm:$0xff]  ;;  %2846 = vrsqrt.f32 %v4665_v57  ;;  %vm1841_vm1 = vcmp.eq.f32.partialorder %v4665_v57, inf  ;;  %vm1843_vm2 = vcmp.eq.f32.partialorder %v4665_v57, 0.0 }
 0x1c6   :  { %1601 = vmatprep.mubr.f32.mxu1 %v2896_v0  ;;  %2268 = vmatpush2.msra.mxu0 %v2587_v48 }
 0x1c7   :  { %2269 = vmatprep.subr.mxu0 %v2896_v0  ;;  %2780 = vmatpush2.msra.mxu1 %v2588_v9 }
 0x1c8   :  { %2270 = vmatpush2.msra.mxu0 %v2586_v62  ;;  %2756 = vmatprep.subr.mxu1 %v2896_v0  ;;  %v4672_v27 = vpop.xlane.xlu1 %1756  ;;  %v2843_v23 = vpop.eup %2842 }
 0x1c9   :  { %2628 = vmatmul.mubr.msk.f32.gmra.mxu1 %vm92_vm0, %v4072_v29  ;;  %2271 = vmatprep.subr.mxu0 %v2896_v0  ;;  %v2585_v29 = vld [vmem:[%s5135_s2 + $0x170] sm:$0xff]  ;;  %2848 = vrsqrt.f32 %v4672_v27  ;;  %vm1848_vm3 = vcmp.eq.f32.partialorder %v4672_v27, inf  ;;  %vm1850_vm4 = vcmp.eq.f32.partialorder %v4672_v27, 0.0 }
 0x1ca   :  { %1607 = vmatprep.mubr.f32.mxu1 %v2896_v0  ;;  %2272 = vmatpush2.msra.mxu0 %v2585_v29 }
 0x1cb   :  { %2273 = vmatprep.subr.mxu0 %v2896_v0  ;;  %2781 = vmatpush2.msra.mxu1 %v2587_v48 }
 0x1cc   :  { %2274 = vmatpush2.msra.mxu0 %v2584_v6  ;;  %2757 = vmatprep.subr.mxu1 %v2896_v0 }
 0x1cd   :  { %2629 = vmatmul.mubr.msk.f32.gmra.mxu1 %vm92_vm0, %v4112_v37  ;;  %2275 = vmatprep.subr.mxu0 %v2896_v0  ;;  %v2583_v37 = vld [vmem:[%s5135_s2 + $0x160] sm:$0xff]  ;;  %v4679_v9 = vpop.xlane.xlu0 %1759 }
 0x1ce   :  { %1613 = vmatprep.mubr.f32.mxu1 %v2896_v0  ;;  %2276 = vmatpush2.msra.mxu0 %v2583_v37  ;;  %2850 = vrsqrt.f32 %v4679_v9  ;;  %vm1855_vm5 = vcmp.eq.f32.partialorder %v4679_v9, inf  ;;  %vm1857_vm7 = vcmp.eq.f32.partialorder %v4679_v9, 0.0 }
 0x1cf   :  { %2277 = vmatprep.subr.mxu0 %v2896_v0  ;;  %2782 = vmatpush2.msra.mxu1 %v2586_v62  ;;  %v1823_v62 = vand.u32 2147483648, %v1745_v22 }
 0x1d0   :  { %2278 = vmatpush2.msra.mxu0 %v2582_v35  ;;  %2758 = vmatprep.subr.mxu1 %v2896_v0 }
 0x1d1   :  { %2630 = vmatmul.mubr.msk.f32.gmra.mxu1 %vm92_vm0, %v4167_v17  ;;  %2279 = vmatprep.subr.mxu0 %v2896_v0  ;;  %v2581_v17 = vld [vmem:[%s5135_s2 + $0x150] sm:$0xff] }
 0x1d2   :  { %1619 = vmatprep.mubr.f32.mxu1 %v2896_v0  ;;  %2280 = vmatpush2.msra.mxu0 %v2581_v17 }
 0x1d3   :  { %2281 = vmatprep.subr.mxu0 %v2896_v0  ;;  %2783 = vmatpush2.msra.mxu1 %v2585_v29 }
 0x1d4   :  { %2282 = vmatpush2.msra.mxu0 %v2580_v5  ;;  %2759 = vmatprep.subr.mxu1 %v2896_v0 }
 0x1d5   :  { %2631 = vmatmul.mubr.msk.f32.gmra.mxu1 %vm92_vm0, %v4216_v56 }
 0x1d6   :  { %1625 = vmatprep.mubr.f32.mxu1 %v2896_v0  ;;  %2784 = vmatpush2.msra.mxu1 %v2584_v6 }
 0x1d7   :  { %2760 = vmatprep.subr.mxu1 %v2896_v0 }
 0x1d8   :  { %2785 = vmatpush2.msra.mxu1 %v2583_v37  ;;  %v1826_v37 = vmul.f32 %v2843_v23, %v1748_v50 }
 0x1d9   :  { %2632 = vmatmul.mubr.msk.f32.gmra.mxu1 %vm92_vm0, %v4260_v55  ;;  %2761 = vmatprep.subr.mxu1 %v2896_v0 }
 0x1da   :  { %1631 = vmatprep.mubr.f32.mxu1 %v2896_v0  ;;  %2786 = vmatpush2.msra.mxu1 %v2582_v35  ;;  %v2845_v35 = vpop.eup %2844 }
 0x1db   :  { %2762 = vmatprep.subr.mxu1 %v2896_v0 }
 0x1dc   :  { %2787 = vmatpush2.msra.mxu1 %v2581_v17  ;;  %v4686_v17 = vpop.xlane.xlu1 %1762 }
 0x1dd   :  { %2633 = vmatmul.mubr.msk.f32.gmra.mxu1 %vm92_vm0, %v4135_v4  ;;  %2763 = vmatprep.subr.mxu1 %v2896_v0  ;;  %2852 = vrsqrt.f32 %v4686_v17  ;;  %vm1862_vm8 = vcmp.eq.f32.partialorder %v4686_v17, inf  ;;  %vm1864_vm9 = vcmp.eq.f32.partialorder %v4686_v17, 0.0 }
 0x1de   :  { %1637 = vmatprep.mubr.f32.mxu1 %v2896_v0  ;;  %2788 = vmatpush2.msra.mxu1 %v2580_v5 }
 0x1e1   :  { %2634 = vmatmul.mubr.msk.f32.gmra.mxu1 %vm92_vm0, %v4184_v36 }
 0x1e2   :  { %1643 = vmatprep.mubr.f32.mxu1 %v2896_v0 }
 0x1e5   :  { %2635 = vmatmul.mubr.msk.f32.gmra.mxu1 %vm92_vm0, %v4233_v7 }
 0x1e6   :  { %1649 = vmatprep.mubr.f32.mxu1 %v2896_v0 }
 0x1e9   :  { %2636 = vmatmul.mubr.msk.f32.gmra.mxu1 %vm92_vm0, %v4272_v34 }
 0x1ea   :  { %1655 = vmatprep.mubr.f32.mxu1 %v2896_v0 }
 0x1ed   :  { %v1075_v4 = vpop.f32.mrf.mxu1  ;;  %2637 = vmatmul.mubr.msk.f32.gmra.mxu1 %vm92_vm0, %v4302_v44 }
 0x1ee   :  { %1200 = vst.msk [vmem:[%s5137_s4] sm:$0xff] %vm1199_vm10, %v1075_v4  ;;  %1661 = vmatprep.mubr.f32.mxu1 %v2896_v0 }
 0x1ef   :  { %v1077_v36 = vpop.f32.mrf.mxu1 }
 0x1f0   :  { %v1830_v36 = vand.u32 2147483648, %v1748_v50 }
 0x1f1   :  { %v1080_v56 = vpop.f32.mrf.mxu1  ;;  %2638 = vmatmul.mubr.msk.f32.gmra.mxu1 %vm92_vm0, %v4329_v51  ;;  %vm1820_vm0 = vcmp.eq.f32.partialorder %v1745_v22, inf }
 0x1f2   :  { %1201 = vst.msk [vmem:[%s5137_s4 + $0x8] sm:$0xff] %vm1199_vm10, %v1080_v56  ;;  %v1821_v6 = vsel %vm1820_vm0, %v1745_v22, %v1819_v46  ;;  %v2644_v22 = vld [vmem:[%s5136_s3 + $0x1b8] sm:$0xff]  ;;  %v2646_v46 = vld [vmem:[%s5136_s3 + $0x1c8] sm:$0xff] }
 0x1f3   :  { %v1082_v7 = vpop.f32.mrf.mxu1  ;;  %v1824_v4 = vsel %vm1822_vm11, %v1823_v62, %v1821_v6  ;;  %v1858_v62 = vand.u32 2147483648, %v4679_v9 }
 0x1f4   :  { %v1828_v7 = vsel %vm1827_vm12, %v1748_v50, %v1826_v37 }
 0x1f5   :  { %v1085_v55 = vpop.f32.mrf.mxu1 }
 0x1f6   :  { %1202 = vst.msk [vmem:[%s5137_s4 + $0x10] sm:$0xff] %vm1199_vm10, %v1085_v55  ;;  %v1833_v55 = vmul.f32 %v2845_v35, %v4658_v2 }
 0x1f7   :  { %v1087_v34 = vpop.f32.mrf.mxu1 }
 0x1f8   :  { %v2847_v34 = vpop.eup %2846 }
 0x1f9   :  { %v1090_v44 = vpop.f32.mrf.mxu1 }
 0x1fa   :  { %1203 = vst.msk [vmem:[%s5137_s4 + $0x18] sm:$0xff] %vm1199_vm10, %v1090_v44  ;;  %v4691_v44 = vpop.xlane.xlu0 %1765 }
 0x1fb   :  { %v1092_v0 = vpop.f32.mrf.mxu1  ;;  %2854 = vrsqrt.f32 %v4691_v44  ;;  %vm1869_vm0 = vcmp.eq.f32.partialorder %v4691_v44, inf  ;;  %vm1871_vm11 = vcmp.eq.f32.partialorder %v4691_v44, 0.0 }
 0x1fd   :  { %v1095_v31 = vpop.f32.mrf.mxu1 }
 0x1fe   :  { %1204 = vst.msk [vmem:[%s5137_s4 + $0x20] sm:$0xff] %vm1199_vm10, %v1095_v31 }
 0x1ff   :  { %v1097_v10 = vpop.f32.mrf.mxu1 }
 0x200   :  { %v2640_v10 = vld [vmem:[%s5136_s3 + $0x198] sm:$0xff] }
 0x201   :  { %v1100_v52 = vpop.f32.mrf.mxu1 }
 0x202   :  { %1205 = vst.msk [vmem:[%s5137_s4 + $0x28] sm:$0xff] %vm1199_vm10, %v1100_v52  ;;  %v2639_v52 = vld [vmem:[%s5136_s3 + $0x190] sm:$0xff] }
 0x203   :  { %v1102_v51 = vpop.f32.mrf.mxu1 }
 0x205   :  { %v1105_v15 = vpop.f32.mrf.mxu1 }
 0x206   :  { %1206 = vst.msk [vmem:[%s5137_s4 + $0x30] sm:$0xff] %vm1199_vm10, %v1105_v15  ;;  %v1831_v15 = vsel %vm1829_vm13, %v1830_v36, %v1828_v7 }
 0x207   :  { %v1107_v8 = vpop.f32.mrf.mxu1 }
 0x208   :  { %v1837_v8 = vand.u32 2147483648, %v4658_v2 }
 0x209   :  { %v1110_v14 = vpop.f32.mrf.mxu1 }
 0x20a   :  { %1207 = vst.msk [vmem:[%s5137_s4 + $0x38] sm:$0xff] %vm1199_vm10, %v1110_v14 }
 0x20b   :  { %v1112_v59 = vpop.f32.mrf.mxu1 }
 0x20c   :  { %v1835_v59 = vsel %vm1834_vm14, %v4658_v2, %v1833_v55  ;;  %v2648_v55 = vld [vmem:[%s5136_s3 + $0x1d8] sm:$0xff] }
 0x20d   :  { %v1115_v45 = vpop.f32.mrf.mxu1 }
 0x20e   :  { %1208 = vst.msk [vmem:[%s5137_s4 + $0x40] sm:$0xff] %vm1199_vm10, %v1115_v45  ;;  %v1840_v45 = vmul.f32 %v2847_v34, %v4665_v57  ;;  %v2647_v34 = vld [vmem:[%s5136_s3 + $0x1d0] sm:$0xff] }
 0x20f   :  { %v1117_v47 = vpop.f32.mrf.mxu1 }
 0x210   :  { %v2849_v47 = vpop.eup %2848 }
 0x211   :  { %v1120_v21 = vpop.f32.mrf.mxu1 }
 0x212   :  { %1209 = vst.msk [vmem:[%s5137_s4 + $0x48] sm:$0xff] %vm1199_vm10, %v1120_v21 }
 0x213   :  { %v1122_v33 = vpop.f32.mrf.mxu1 }
 0x214   :  { %v4705_v33 = vpop.xlane.xlu1 %1768 }
 0x215   :  { %v1125_v13 = vpop.f32.mrf.mxu1  ;;  %2856 = vrsqrt.f32 %v4705_v33  ;;  %vm1876_vm12 = vcmp.eq.f32.partialorder %v4705_v33, inf  ;;  %vm1878_vm13 = vcmp.eq.f32.partialorder %v4705_v33, 0.0 }
 0x216   :  { %1210 = vst.msk [vmem:[%s5137_s4 + $0x50] sm:$0xff] %vm1199_vm10, %v1125_v13 }
 0x217   :  { %v1127_v49 = vpop.f32.mrf.mxu1 }
 0x219   :  { %v1130_v1 = vpop.f32.mrf.mxu1 }
 0x21a   :  { %1211 = vst.msk [vmem:[%s5137_s4 + $0x58] sm:$0xff] %vm1199_vm10, %v1130_v1 }
 0x21b   :  { %v1132_v25 = vpop.f32.mrf.mxu1 }
 0x21c   :  { %v2642_v25 = vld [vmem:[%s5136_s3 + $0x1a8] sm:$0xff] }
 0x21d   :  { %v1135_v54 = vpop.f32.mrf.mxu1 }
 0x21e   :  { %1212 = vst.msk [vmem:[%s5137_s4 + $0x60] sm:$0xff] %vm1199_vm10, %v1135_v54  ;;  %v2641_v54 = vld [vmem:[%s5136_s3 + $0x1a0] sm:$0xff] }
 0x21f   :  { %v1137_v32 = vpop.f32.mrf.mxu1 }
 0x221   :  { %v1140_v28 = vpop.f32.mrf.mxu1 }
 0x222   :  { %1213 = vst.msk [vmem:[%s5137_s4 + $0x68] sm:$0xff] %vm1199_vm10, %v1140_v28  ;;  %v1838_v28 = vsel %vm1836_vm15, %v1837_v8, %v1835_v59 }
 0x223   :  { %v1142_v38 = vpop.f32.mrf.mxu1 }
 0x224   :  { %v1844_v38 = vand.u32 2147483648, %v4665_v57 }
 0x225   :  { %v1145_v39 = vpop.f32.mrf.mxu1 }
 0x226   :  { %1214 = vst.msk [vmem:[%s5137_s4 + $0x70] sm:$0xff] %vm1199_vm10, %v1145_v39  ;;  %v4715_v39 = vpop.xlane.xlu0 %1771 }
 0x227   :  { %v1147_v61 = vpop.f32.mrf.mxu1  ;;  %2858 = vrsqrt.f32 %v4715_v39  ;;  %vm1883_vm14 = vcmp.eq.f32.partialorder %v4715_v39, inf  ;;  %vm1885_vm15 = vcmp.eq.f32.partialorder %v4715_v39, 0.0 }
 0x229   :  { %v1150_v42 = vpop.f32.mrf.mxu1 }
 0x22a   :  { %1215 = vst.msk [vmem:[%s5137_s4 + $0x78] sm:$0xff] %vm1199_vm10, %v1150_v42  ;;  %v1842_v42 = vsel %vm1841_vm1, %v4665_v57, %v1840_v45 }
 0x22b   :  { %v1152_v30 = vpop.f32.mrf.mxu1  ;;  %v1845_v50 = vsel %vm1843_vm2, %v1844_v38, %v1842_v42 }
 0x22c   :  { %v1847_v30 = vmul.f32 %v2849_v47, %v4672_v27 }
 0x22d   :  { %v1155_v43 = vpop.f32.mrf.mxu1 }
 0x22e   :  { %1216 = vst.msk [vmem:[%s5137_s4 + $0x80] sm:$0xff] %vm1199_vm10, %v1155_v43  ;;  %v2851_v43 = vpop.eup %2850 }
 0x22f   :  { %v1157_v19 = vpop.f32.mrf.mxu1  ;;  %v2853_v57 = vpop.eup %2852 }
 0x230   :  { %v1861_v35 = vmul.f32 %v2853_v57, %v4686_v17 }
 0x231   :  { %v1160_v20 = vpop.f32.mrf.mxu1 }
 0x232   :  { %1217 = vst.msk [vmem:[%s5137_s4 + $0x88] sm:$0xff] %vm1199_vm10, %v1160_v20 }
 0x233   :  { %v1162_v3 = vpop.f32.mrf.mxu1 }
 0x235   :  { %v1165_v12 = vpop.f32.mrf.mxu1 }
 0x236   :  { %1218 = vst.msk [vmem:[%s5137_s4 + $0x90] sm:$0xff] %vm1199_vm10, %v1165_v12 }
 0x237   :  { %v1167_v58 = vpop.f32.mrf.mxu1 }
 0x238   :  { %v2643_v58 = vld [vmem:[%s5136_s3 + $0x1b0] sm:$0xff] }
 0x239   :  { %v1170_v18 = vpop.f32.mrf.mxu1 }
 0x23a   :  { %1219 = vst.msk [vmem:[%s5137_s4 + $0x98] sm:$0xff] %vm1199_vm10, %v1170_v18 }
 0x23b   :  { %v1172_v16 = vpop.f32.mrf.mxu1 }
 0x23c   :  { %v1851_v16 = vand.u32 2147483648, %v4672_v27 }
 0x23d   :  { %v1175_v63 = vpop.f32.mrf.mxu1 }
 0x23e   :  { %1220 = vst.msk [vmem:[%s5137_s4 + $0xa0] sm:$0xff] %vm1199_vm10, %v1175_v63  ;;  %v4730_v63 = vpop.xlane.xlu0 %1777 }
 0x23f   :  { %v1177_v24 = vpop.f32.mrf.mxu1 }
 0x240   :  { %v1849_v24 = vsel %vm1848_vm3, %v4672_v27, %v1847_v30  ;;  %v2645_v27 = vld [vmem:[%s5136_s3 + $0x1c0] sm:$0xff]  ;;  %vm1897_vm3 = vcmp.eq.f32.partialorder %v4730_v63, inf }
 0x241   :  { %v1180_v53 = vpop.f32.mrf.mxu1 }
 0x242   :  { %1221 = vst.msk [vmem:[%s5137_s4 + $0xa8] sm:$0xff] %vm1199_vm10, %v1180_v53  ;;  %v1854_v53 = vmul.f32 %v2851_v43, %v4679_v9 }
 0x243   :  { %v1182_v41 = vpop.f32.mrf.mxu1 }
 0x244   :  { %v1856_v37 = vsel %vm1855_vm5, %v4679_v9, %v1854_v53 }
 0x245   :  { %v1185_v11 = vpop.f32.mrf.mxu1 }
 0x246   :  { %1222 = vst.msk [vmem:[%s5137_s4 + $0xb0] sm:$0xff] %vm1199_vm10, %v1185_v11  ;;  %v4737_v11 = vpop.xlane.xlu1 %1774 }
 0x247   :  { %v1187_v26 = vpop.f32.mrf.mxu1  ;;  %2860 = vrsqrt.f32 %v4737_v11  ;;  %vm1890_vm1 = vcmp.eq.f32.partialorder %v4737_v11, inf  ;;  %vm1892_vm2 = vcmp.eq.f32.partialorder %v4737_v11, 0.0 }
 0x248   :  { %2862 = vrsqrt.f32 %v4730_v63 }
 0x249   :  { %v1190_v60 = vpop.f32.mrf.mxu1 }
 0x24a   :  { %1223 = vst.msk [vmem:[%s5137_s4 + $0xb8] sm:$0xff] %vm1199_vm10, %v1190_v60 }
 0x24b   :  { %v1192_v48 = vpop.f32.mrf.mxu1 }
 0x24c   :  { %v1852_v48 = vsel %vm1850_vm4, %v1851_v16, %v1849_v24  ;;  %vm1899_vm4 = vcmp.eq.f32.partialorder %v4730_v63, 0.0 }
 0x24d   :  { %v1195_v29 = vpop.f32.mrf.mxu1 }
 0x24e   :  { %1224 = vst.msk [vmem:[%s5137_s4 + $0xc0] sm:$0xff] %vm1199_vm10, %v1195_v29  ;;  %v4747_v29 = vpop.xlane.xlu0 %1783 }
 0x24f   :  { %v1197_v5 = vpop.f32.mrf.mxu1 }
 0x250   :  { %v2855_v5 = vpop.eup %2854 }
 0x251   :  { %v1519_v56 = vpop.f32.mrf.mxu1 }
 0x252   :  { %v1993_v0 = vmul.f32 %v1824_v4, %v1519_v56  ;;  %v4769_v59 = vpop.xlane.xlu0 %1786 }
 0x253   :  { %v1521_v31 = vpop.f32.mrf.mxu1 }
 0x254   :  { %v1994_v51 = vmul.f32 %v1824_v4, %v1521_v31  ;;  %v2094_v13 = vmul.f32 %v2639_v52, %v1993_v0  ;;  %v1859_v0 = vsel %vm1857_vm7, %v1858_v62, %v1856_v37  ;;  %v1865_v31 = vand.u32 2147483648, %v4686_v17 }
 0x255   :  { %v1525_v14 = vpop.f32.mrf.mxu1  ;;  %v1863_v52 = vsel %vm1862_vm8, %v4686_v17, %v1861_v35  ;;  %v2649_v17 = vld [vmem:[%s5136_s3 + $0x1e0] sm:$0xff]  ;;  %vm1911_vm8 = vcmp.eq.f32.partialorder %v4747_v29, inf }
 0x256   :  { %v2095_v21 = vmul.f32 %v2640_v10, %v1994_v51  ;;  %v1995_v49 = vmul.f32 %v1831_v15, %v1525_v14  ;;  %v1868_v51 = vmul.f32 %v2855_v5, %v4691_v44  ;;  %v4767_v14 = vpop.xlane.xlu1 %1780 }
 0x257   :  { %v1527_v1 = vpop.f32.mrf.mxu1  ;;  %2864 = vrsqrt.f32 %v4767_v14  ;;  %vm1904_vm5 = vcmp.eq.f32.partialorder %v4767_v14, inf  ;;  %vm1906_vm7 = vcmp.eq.f32.partialorder %v4767_v14, 0.0 }
 0x258   :  { %v1996_v32 = vmul.f32 %v1831_v15, %v1527_v1  ;;  %2689 = vmatprep.mubr.msk.f32.mxu0 %vm933_vm6, %v2095_v21  ;;  %v2096_v20 = vmul.f32 %v2641_v54, %v1995_v49  ;;  %v2857_v15 = vpop.eup %2856  ;;  %v1866_v1 = vsel %vm1864_vm9, %v1865_v31, %v1863_v52  ;;  %2866 = vrsqrt.f32 %v4747_v29 }
 0x259   :  { %v1531_v61 = vpop.f32.mrf.mxu1  ;;  %2284 = vmatmul.mubr.f32.vlgmr.msra.gmra.mxu0 %v2094_v13  ;;  %v2650_v13 = vld [vmem:[%s5136_s3 + $0x1e8] sm:$0xff]  ;;  %v2859_v38 = vpop.eup %2858  ;;  %2868 = vrsqrt.f32 %v4769_v59  ;;  %vm1913_vm9 = vcmp.eq.f32.partialorder %v4747_v29, 0.0 }
 0x25a   :  { %v2097_v19 = vmul.f32 %v2642_v25, %v1996_v32  ;;  %v1997_v3 = vmul.f32 %v1838_v28, %v1531_v61  ;;  %v1872_v25 = vand.u32 2147483648, %v4691_v44  ;;  %v1870_v32 = vsel %vm1869_vm0, %v4691_v44, %v1868_v51  ;;  %v2861_v16 = vpop.eup %2860 }
 0x25b   :  { %v1533_v12 = vpop.f32.mrf.mxu1  ;;  %vm1918_vm0 = vcmp.eq.f32.partialorder %v4769_v59, inf }
 0x25c   :  { %v1998_v18 = vmul.f32 %v1838_v28, %v1533_v12  ;;  %2690 = vmatprep.mubr.msk.f32.mxu0 %vm933_vm6, %v2097_v19  ;;  %v2098_v40 = vmul.f32 %v2643_v58, %v1997_v3  ;;  %v1875_v28 = vmul.f32 %v2857_v15, %v4705_v33  ;;  %v2652_v19 = vld [vmem:[%s5136_s3 + $0x1f8] sm:$0xff]  ;;  %v1873_v3 = vsel %vm1871_vm11, %v1872_v25, %v1870_v32  ;;  %v2658_v15 = vld [vmem:[%s5136_s3 + $0x228] sm:$0xff] }
 0x25d   :  { %v1537_v2 = vpop.f32.mrf.mxu1  ;;  %2289 = vmatmul.mubr.f32.gmra.mxu0 %v2096_v20  ;;  %v2651_v20 = vld [vmem:[%s5136_s3 + $0x1f0] sm:$0xff]  ;;  %v1879_v12 = vand.u32 2147483648, %v4705_v33  ;;  %vm1920_vm11 = vcmp.eq.f32.partialorder %v4769_v59, 0.0 }
 0x25e   :  { %v2099_v41 = vmul.f32 %v2644_v22, %v1998_v18  ;;  %v1999_v26 = vmul.f32 %v1845_v50, %v1537_v2  ;;  %v4792_v22 = vpop.xlane.xlu0 %1789  ;;  %v1877_v18 = vsel %vm1876_vm12, %v4705_v33, %v1875_v28 }
 0x25f   :  { %v1539_v60 = vpop.f32.mrf.mxu1  ;;  %2870 = vrsqrt.f32 %v4792_v22  ;;  %vm1925_vm12 = vcmp.eq.f32.partialorder %v4792_v22, inf }
 0x260   :  { %v2000_v23 = vmul.f32 %v1845_v50, %v1539_v60  ;;  %2691 = vmatprep.mubr.msk.f32.mxu0 %vm933_vm6, %v2099_v41  ;;  %v2100_v36 = vmul.f32 %v2645_v27, %v1999_v26  ;;  %v1882_v50 = vmul.f32 %v2859_v38, %v4715_v39  ;;  %v2654_v41 = vld [vmem:[%s5136_s3 + $0x208] sm:$0xff]  ;;  %v1880_v26 = vsel %vm1878_vm13, %v1879_v12, %v1877_v18 }
 0x261   :  { %v1543_v6 = vpop.f32.mrf.mxu1  ;;  %2294 = vmatmul.mubr.f32.gmra.mxu0 %v2098_v40  ;;  %v2653_v40 = vld [vmem:[%s5136_s3 + $0x200] sm:$0xff]  ;;  %v1886_v60 = vand.u32 2147483648, %v4715_v39  ;;  %vm1927_vm13 = vcmp.eq.f32.partialorder %v4792_v22, 0.0 }
 0x262   :  { %v2101_v4 = vmul.f32 %v2646_v46, %v2000_v23  ;;  %v2001_v56 = vmul.f32 %v1852_v48, %v1543_v6  ;;  %v1884_v27 = vsel %vm1883_vm14, %v4715_v39, %v1882_v50  ;;  %v1889_v23 = vmul.f32 %v2861_v16, %v4737_v11  ;;  %v4812_v6 = vpop.xlane.xlu0 %1792  ;;  %v2655_v39 = vld [vmem:[%s5136_s3 + $0x210] sm:$0xff] }
 0x263   :  { %v1545_v7 = vpop.f32.mrf.mxu1  ;;  %2872 = vrsqrt.f32 %v4812_v6  ;;  %vm1932_vm14 = vcmp.eq.f32.partialorder %v4812_v6, inf }
 0x264   :  { %v2002_v9 = vmul.f32 %v1852_v48, %v1545_v7  ;;  %2692 = vmatprep.mubr.msk.f32.mxu0 %vm933_vm6, %v2101_v4  ;;  %v2102_v45 = vmul.f32 %v2647_v34, %v2001_v56  ;;  %v2863_v48 = vpop.eup %2862  ;;  %v2656_v4 = vld [vmem:[%s5136_s3 + $0x218] sm:$0xff]  ;;  %v1887_v56 = vsel %vm1885_vm15, %v1886_v60, %v1884_v27  ;;  %v1893_v7 = vand.u32 2147483648, %v4737_v11 }
 0x265   :  { %v1549_v10 = vpop.f32.mrf.mxu1  ;;  %2299 = vmatmul.mubr.f32.gmra.mxu0 %v2100_v36  ;;  %v1891_v34 = vsel %vm1890_vm1, %v4737_v11, %v1889_v23  ;;  %vm1934_vm15 = vcmp.eq.f32.partialorder %v4812_v6, 0.0 }
 0x266   :  { %v2103_v8 = vmul.f32 %v2648_v55, %v2002_v9  ;;  %v2003_v47 = vmul.f32 %v1859_v0, %v1549_v10  ;;  %v1896_v9 = vmul.f32 %v2863_v48, %v4730_v63 }
 0x267   :  { %v1551_v21 = vpop.f32.mrf.mxu1 }
 0x268   :  { %v2004_v49 = vmul.f32 %v1859_v0, %v1551_v21  ;;  %2693 = vmatprep.mubr.msk.f32.mxu0 %vm933_vm6, %v2103_v8  ;;  %v2104_v42 = vmul.f32 %v2649_v17, %v2003_v47  ;;  %v2865_v0 = vpop.eup %2864  ;;  %v2657_v8 = vld [vmem:[%s5136_s3 + $0x220] sm:$0xff]  ;;  %v1900_v47 = vand.u32 2147483648, %v4730_v63  ;;  %v4835_v21 = vpop.xlane.xlu0 %1795  ;;  %v1898_v17 = vsel %vm1897_vm3, %v4730_v63, %v1896_v9  ;;  %v2659_v63 = vld [vmem:[%s5136_s3 + $0x230] sm:$0xff] }
 0x269   :  { %v1555_v54 = vpop.f32.mrf.mxu1  ;;  %2304 = vmatmul.mubr.f32.gmra.mxu0 %v2102_v45  ;;  %v1894_v45 = vsel %vm1892_vm2, %v1893_v7, %v1891_v34  ;;  %2874 = vrsqrt.f32 %v4835_v21  ;;  %vm1939_vm1 = vcmp.eq.f32.partialorder %v4835_v21, inf  ;;  %vm1941_vm2 = vcmp.eq.f32.partialorder %v4835_v21, 0.0 }
 0x26a   :  { %v2105_v61 = vmul.f32 %v2650_v13, %v2004_v49  ;;  %v2005_v30 = vmul.f32 %v1866_v1, %v1555_v54  ;;  %v1903_v49 = vmul.f32 %v2865_v0, %v4767_v14  ;;  %v4841_v54 = vpop.xlane.xlu1 %1801 }
 0x26b   :  { %v1557_v43 = vpop.f32.mrf.mxu1 }
 0x26c   :  { %v2006_v44 = vmul.f32 %v1866_v1, %v1557_v43  ;;  %2694 = vmatprep.mubr.msk.f32.mxu0 %vm933_vm6, %v2105_v61  ;;  %v2106_v24 = vmul.f32 %v2651_v20, %v2005_v30  ;;  %v2867_v1 = vpop.eup %2866  ;;  %v2660_v61 = vld [vmem:[%s5136_s3 + $0x238] sm:$0xff]  ;;  %v1901_v30 = vsel %vm1899_vm4, %v1900_v47, %v1898_v17  ;;  %v1907_v43 = vand.u32 2147483648, %v4767_v14 }
 0x26d   :  { %v1561_v58 = vpop.f32.mrf.mxu1  ;;  %2309 = vmatmul.mubr.f32.gmra.mxu0 %v2104_v42  ;;  %v1905_v20 = vsel %vm1904_vm5, %v4767_v14, %v1903_v49  ;;  %v2661_v14 = vld [vmem:[%s5136_s3 + $0x240] sm:$0xff]  ;;  %vm1953_vm5 = vcmp.eq.f32.partialorder %v4841_v54, inf }
 0x26e   :  { %v2107_v2 = vmul.f32 %v2652_v19, %v2006_v44  ;;  %v2007_v53 = vmul.f32 %v1873_v3, %v1561_v58  ;;  %v1910_v44 = vmul.f32 %v2867_v1, %v4747_v29  ;;  %v4857_v58 = vpop.xlane.xlu0 %1798  ;;  %v2668_v1 = vld [vmem:[%s5136_s3 + $0x278] sm:$0xff] }
 0x26f   :  { %v1563_v57 = vpop.f32.mrf.mxu1  ;;  %2876 = vrsqrt.f32 %v4857_v58  ;;  %vm1946_vm3 = vcmp.eq.f32.partialorder %v4857_v58, inf  ;;  %vm1948_vm4 = vcmp.eq.f32.partialorder %v4857_v58, 0.0 }
 0x270   :  { %v2008_v33 = vmul.f32 %v1873_v3, %v1563_v57  ;;  %2695 = vmatprep.mubr.msk.f32.mxu0 %vm933_vm6, %v2107_v2  ;;  %v2108_v37 = vmul.f32 %v2653_v40, %v2007_v53  ;;  %v2869_v3 = vpop.eup %2868  ;;  %v2662_v2 = vld [vmem:[%s5136_s3 + $0x248] sm:$0xff]  ;;  %v4866_v53 = vpop.xlane.xlu1 %1804  ;;  %v1908_v57 = vsel %vm1906_vm7, %v1907_v43, %v1905_v20  ;;  %2878 = vrsqrt.f32 %v4841_v54 }
 0x271   :  { %v1567_v46 = vpop.f32.mrf.mxu1  ;;  %2314 = vmatmul.mubr.f32.gmra.mxu0 %v2106_v24  ;;  %v2871_v60 = vpop.eup %2870  ;;  %2880 = vrsqrt.f32 %v4866_v53  ;;  %vm1955_vm7 = vcmp.eq.f32.partialorder %v4841_v54, 0.0 }
 0x272   :  { %v2109_v62 = vmul.f32 %v2654_v41, %v2008_v33  ;;  %v2009_v35 = vmul.f32 %v1880_v26, %v1567_v46  ;;  %v1914_v41 = vand.u32 2147483648, %v4747_v29  ;;  %v1912_v33 = vsel %vm1911_vm8, %v4747_v29, %v1910_v44 }
 0x273   :  { %v1569_v5 = vpop.f32.mrf.mxu1  ;;  %vm1960_vm8 = vcmp.eq.f32.partialorder %v4866_v53, inf }
 0x274   :  { %v2010_v36 = vmul.f32 %v1880_v26, %v1569_v5  ;;  %2696 = vmatprep.mubr.msk.f32.mxu0 %vm933_vm6, %v2109_v62  ;;  %v2110_v10 = vmul.f32 %v2655_v39, %v2009_v35  ;;  %v1917_v26 = vmul.f32 %v2869_v3, %v4769_v59  ;;  %v2664_v62 = vld [vmem:[%s5136_s3 + $0x258] sm:$0xff]  ;;  %v1915_v35 = vsel %vm1913_vm9, %v1914_v41, %v1912_v33  ;;  %v2670_v3 = vld [vmem:[%s5136_s3 + $0x288] sm:$0xff] }
 0x275   :  { %v1573_v55 = vpop.f32.mrf.mxu1  ;;  %2319 = vmatmul.mubr.f32.gmra.mxu0 %v2108_v37  ;;  %v2663_v37 = vld [vmem:[%s5136_s3 + $0x250] sm:$0xff]  ;;  %v1921_v5 = vand.u32 2147483648, %v4769_v59  ;;  %vm1962_vm9 = vcmp.eq.f32.partialorder %v4866_v53, 0.0 }
 0x276   :  { %v2111_v31 = vmul.f32 %v2656_v4, %v2010_v36  ;;  %v2011_v52 = vmul.f32 %v1887_v56, %v1573_v55  ;;  %v1919_v39 = vsel %vm1918_vm0, %v4769_v59, %v1917_v26  ;;  %v1924_v36 = vmul.f32 %v2871_v60, %v4792_v22  ;;  %v4886_v55 = vpop.xlane.xlu1 %1807  ;;  %v2665_v59 = vld [vmem:[%s5136_s3 + $0x260] sm:$0xff]  ;;  %v2672_v60 = vld [vmem:[%s5136_s3 + $0x298] sm:$0xff] }
 0x277   :  { %v1575_v51 = vpop.f32.mrf.mxu1  ;;  %2882 = vrsqrt.f32 %v4886_v55  ;;  %vm1967_vm0 = vcmp.eq.f32.partialorder %v4886_v55, inf }
 0x278   :  { %v2012_v11 = vmul.f32 %v1887_v56, %v1575_v51  ;;  %2697 = vmatprep.mubr.msk.f32.mxu0 %vm933_vm6, %v2111_v31  ;;  %v2112_v32 = vmul.f32 %v2657_v8, %v2011_v52  ;;  %v2873_v56 = vpop.eup %2872  ;;  %v2666_v31 = vld [vmem:[%s5136_s3 + $0x268] sm:$0xff]  ;;  %v1922_v52 = vsel %vm1920_vm11, %v1921_v5, %v1919_v39  ;;  %v1928_v51 = vand.u32 2147483648, %v4792_v22 }
 0x279   :  { %v1579_v13 = vpop.f32.mrf.mxu1  ;;  %2324 = vmatmul.mubr.f32.gmra.mxu0 %v2110_v10  ;;  %v1926_v8 = vsel %vm1925_vm12, %v4792_v22, %v1924_v36  ;;  %v2667_v22 = vld [vmem:[%s5136_s3 + $0x270] sm:$0xff]  ;;  %v2674_v36 = vld [vmem:[%s5136_s3 + $0x2a8] sm:$0xff]  ;;  %vm1969_vm11 = vcmp.eq.f32.partialorder %v4886_v55, 0.0 }
 0x27a   :  { %v2113_v25 = vmul.f32 %v2658_v15, %v2012_v11  ;;  %v2013_v28 = vmul.f32 %v1894_v45, %v1579_v13  ;;  %v1931_v11 = vmul.f32 %v2873_v56, %v4812_v6 }
 0x27b   :  { %v1581_v38 = vpop.f32.mrf.mxu1 }
 0x27c   :  { %v2014_v42 = vmul.f32 %v1894_v45, %v1581_v38  ;;  %2698 = vmatprep.mubr.msk.f32.mxu0 %vm933_vm6, %v2113_v25  ;;  %v2114_v18 = vmul.f32 %v2659_v63, %v2013_v28  ;;  %v2875_v45 = vpop.eup %2874  ;;  %v4905_v25 = vpop.xlane.xlu1 %1810  ;;  %v1929_v28 = vsel %vm1927_vm13, %v1928_v51, %v1926_v8  ;;  %v1935_v38 = vand.u32 2147483648, %v4812_v6 }
 0x27d   :  { %v1585_v19 = vpop.f32.mrf.mxu1  ;;  %2329 = vmatmul.mubr.f32.gmra.mxu0 %v2112_v32  ;;  %v1933_v63 = vsel %vm1932_vm14, %v4812_v6, %v1931_v11  ;;  %2884 = vrsqrt.f32 %v4905_v25  ;;  %v2676_v11 = vld [vmem:[%s5136_s3 + $0x2b8] sm:$0xff]  ;;  %vm1974_vm12 = vcmp.eq.f32.partialorder %v4905_v25, inf  ;;  %vm1976_vm13 = vcmp.eq.f32.partialorder %v4905_v25, 0.0 }
 0x27e   :  { %v2115_v12 = vmul.f32 %v2660_v61, %v2014_v42  ;;  %v2015_v50 = vmul.f32 %v1901_v30, %v1585_v19  ;;  %v1938_v42 = vmul.f32 %v2875_v45, %v4835_v21  ;;  %v2675_v45 = vld [vmem:[%s5136_s3 + $0x2b0] sm:$0xff] }
 0x27f   :  { %v1587_v16 = vpop.f32.mrf.mxu1 }
 0x280   :  { %v2016_v24 = vmul.f32 %v1901_v30, %v1587_v16  ;;  %2699 = vmatprep.mubr.msk.f32.mxu0 %vm933_vm6, %v2115_v12  ;;  %v2116_v27 = vmul.f32 %v2661_v14, %v2015_v50  ;;  %v2877_v30 = vpop.eup %2876  ;;  %v2669_v12 = vld [vmem:[%s5136_s3 + $0x280] sm:$0xff]  ;;  %v1942_v50 = vand.u32 2147483648, %v4835_v21 }
 0x281   :  { %v1591_v40 = vpop.f32.mrf.mxu1  ;;  %2334 = vmatmul.mubr.f32.gmra.mxu0 %v2114_v18  ;;  %v1936_v18 = vsel %vm1934_vm15, %v1935_v38, %v1933_v63  ;;  %v1945_v14 = vmul.f32 %v2877_v30, %v4857_v58  ;;  %v2879_v41 = vpop.eup %2878  ;;  %v2678_v63 = vld [vmem:[%s5136_s3 + $0x2c8] sm:$0xff] }
 0x282   :  { %v2117_v46 = vmul.f32 %v2662_v2, %v2016_v24  ;;  %v2017_v23 = vmul.f32 %v1908_v57, %v1591_v40  ;;  %v1940_v2 = vsel %vm1939_vm1, %v4835_v21, %v1938_v42  ;;  %v4929_v24 = vpop.xlane.xlu1 %1813  ;;  %v2671_v21 = vld [vmem:[%s5136_s3 + $0x290] sm:$0xff]  ;;  %v2677_v42 = vld [vmem:[%s5136_s3 + $0x2c0] sm:$0xff] }
 0x283   :  { %v1593_v48 = vpop.f32.mrf.mxu1  ;;  %2886 = vrsqrt.f32 %v4929_v24  ;;  %vm1981_vm14 = vcmp.eq.f32.partialorder %v4929_v24, inf  ;;  %vm1983_vm15 = vcmp.eq.f32.partialorder %v4929_v24, 0.0 }
 0x284   :  { %v2018_v29 = vmul.f32 %v1908_v57, %v1593_v48  ;;  %2700 = vmatprep.mubr.msk.f32.mxu0 %vm933_vm6, %v2117_v46  ;;  %v2118_v34 = vmul.f32 %v2663_v37, %v2017_v23  ;;  %v1949_v23 = vand.u32 2147483648, %v4857_v58 }
 0x285   :  { %v1597_v4 = vpop.f32.mrf.mxu1  ;;  %2339 = vmatmul.mubr.f32.gmra.mxu0 %v2116_v27  ;;  %v1943_v27 = vsel %vm1941_vm2, %v1942_v50, %v1940_v2  ;;  %v2679_v2 = vld [vmem:[%s5136_s3 + $0x2d0] sm:$0xff] }
 0x286   :  { %v2119_v7 = vmul.f32 %v2664_v62, %v2018_v29  ;;  %v2019_v9 = vmul.f32 %v1915_v35, %v1597_v4  ;;  %v1947_v62 = vsel %vm1946_vm3, %v4857_v58, %v1945_v14  ;;  %v1952_v29 = vmul.f32 %v2879_v41, %v4841_v54  ;;  %v4948_v56 = vpop.xlane.xlu1 %1816  ;;  %v2673_v58 = vld [vmem:[%s5136_s3 + $0x2a0] sm:$0xff] }
 0x287   :  { %v1599_v0 = vpop.f32.mrf.mxu1  ;;  %2888 = vrsqrt.f32 %v4948_v56  ;;  %vm1988_vm1 = vcmp.eq.f32.partialorder %v4948_v56, inf  ;;  %vm1990_vm2 = vcmp.eq.f32.partialorder %v4948_v56, 0.0 }
 0x288   :  { %v2020_v10 = vmul.f32 %v1915_v35, %v1599_v0  ;;  %2701 = vmatprep.mubr.msk.f32.mxu0 %vm933_vm6, %v2119_v7  ;;  %v2120_v13 = vmul.f32 %v2665_v59, %v2019_v9  ;;  %v2881_v35 = vpop.eup %2880  ;;  %v1956_v0 = vand.u32 2147483648, %v4841_v54  ;;  %v1954_v59 = vsel %vm1953_vm5, %v4841_v54, %v1952_v29 }
 0x289   :  { %v1603_v15 = vpop.f32.mrf.mxu1  ;;  %2344 = vmatmul.mubr.f32.gmra.mxu0 %v2118_v34  ;;  %v1950_v34 = vsel %vm1948_vm4, %v1949_v23, %v1947_v62 }
 0x28a   :  { %v2121_v47 = vmul.f32 %v2666_v31, %v2020_v10  ;;  %v2021_v17 = vmul.f32 %v1922_v52, %v1603_v15  ;;  %v1959_v10 = vmul.f32 %v2881_v35, %v4866_v53 }
 0x28b   :  { %v1605_v49 = vpop.f32.mrf.mxu1 }
 0x28c   :  { %v2022_v32 = vmul.f32 %v1922_v52, %v1605_v49  ;;  %2702 = vmatprep.mubr.msk.f32.mxu0 %vm933_vm6, %v2121_v47  ;;  %v2122_v19 = vmul.f32 %v2667_v22, %v2021_v17  ;;  %v2883_v52 = vpop.eup %2882  ;;  %v1963_v17 = vand.u32 2147483648, %v4866_v53 }
 0x28d   :  { %v1609_v61 = vpop.f32.mrf.mxu1  ;;  %2349 = vmatmul.mubr.f32.gmra.mxu0 %v2120_v13  ;;  %v1957_v13 = vsel %vm1955_vm7, %v1956_v0, %v1954_v59  ;;  %v1966_v22 = vmul.f32 %v2883_v52, %v4886_v55 }
 0x28e   :  { %v2123_v43 = vmul.f32 %v2668_v1, %v2022_v32  ;;  %v2023_v20 = vmul.f32 %v1929_v28, %v1609_v61  ;;  %v1961_v1 = vsel %vm1960_vm8, %v4866_v53, %v1959_v10  ;;  %v2885_v32 = vpop.eup %2884  ;;  %v1991_v10 = vand.u32 2147483648, %v4948_v56 }
 0x28f   :  { %v1611_v44 = vpop.f32.mrf.mxu1 }
 0x290   :  { %v2024_v6 = vmul.f32 %v1929_v28, %v1611_v44  ;;  %2703 = vmatprep.mubr.msk.f32.mxu0 %vm933_vm6, %v2123_v43  ;;  %v2124_v40 = vmul.f32 %v2669_v12, %v2023_v20  ;;  %v1964_v43 = vsel %vm1962_vm9, %v1963_v17, %v1961_v1  ;;  %v1968_v44 = vsel %vm1967_vm0, %v4886_v55, %v1966_v22  ;;  %v2887_v12 = vpop.eup %2886  ;;  %v2688_v22 = vld [vmem:[%s5136_s3 + $0x318] sm:$0xff] }
 0x291   :  { %v1615_v16 = vpop.f32.mrf.mxu1  ;;  %2354 = vmatmul.mubr.f32.gmra.mxu0 %v2122_v19  ;;  %v1970_v19 = vand.u32 2147483648, %v4886_v55 }
 0x292   :  { %v2125_v57 = vmul.f32 %v2670_v3, %v2024_v6  ;;  %v2025_v33 = vmul.f32 %v1936_v18, %v1615_v16  ;;  %v1973_v3 = vmul.f32 %v2885_v32, %v4905_v25  ;;  %v2680_v16 = vld [vmem:[%s5136_s3 + $0x2d8] sm:$0xff] }
 0x293   :  { %v1617_v26 = vpop.f32.mrf.mxu1 }
 0x294   :  { %v2026_v46 = vmul.f32 %v1936_v18, %v1617_v26  ;;  %2704 = vmatprep.mubr.msk.f32.mxu0 %vm933_vm6, %v2125_v57  ;;  %v2126_v5 = vmul.f32 %v2671_v21, %v2025_v33  ;;  %v1971_v57 = vsel %vm1969_vm11, %v1970_v19, %v1968_v44  ;;  %v1977_v33 = vand.u32 2147483648, %v4905_v25  ;;  %v2889_v23 = vpop.eup %2888 }
 0x295   :  { %v1621_v48 = vpop.f32.mrf.mxu1  ;;  %2359 = vmatmul.mubr.f32.gmra.mxu0 %v2124_v40  ;;  %v1975_v40 = vsel %vm1974_vm12, %v4905_v25, %v1973_v3  ;;  %v1980_v26 = vmul.f32 %v2887_v12, %v4929_v24 }
 0x296   :  { %v2127_v37 = vmul.f32 %v2672_v60, %v2026_v46  ;;  %v2027_v4 = vmul.f32 %v1943_v27, %v1621_v48  ;;  %v2681_v48 = vld [vmem:[%s5136_s3 + $0x2e0] sm:$0xff]  ;;  %v1978_v35 = vsel %vm1976_vm13, %v1977_v33, %v1975_v40 }
 0x297   :  { %v1623_v39 = vpop.f32.mrf.mxu1 }
 0x298   :  { %v2028_v7 = vmul.f32 %v1943_v27, %v1623_v39  ;;  %2705 = vmatprep.mubr.msk.f32.mxu0 %vm933_vm6, %v2127_v37  ;;  %v2128_v51 = vmul.f32 %v2673_v58, %v2027_v4  ;;  %v2682_v27 = vld [vmem:[%s5136_s3 + $0x2e8] sm:$0xff]  ;;  %v1984_v4 = vand.u32 2147483648, %v4929_v24  ;;  %v2684_v58 = vld [vmem:[%s5136_s3 + $0x2f8] sm:$0xff] }
 0x299   :  { %v1627_v9 = vpop.f32.mrf.mxu1  ;;  %2364 = vmatmul.mubr.f32.gmra.mxu0 %v2126_v5  ;;  %v1982_v5 = vsel %vm1981_vm14, %v4929_v24, %v1980_v26 }
 0x29a   :  { %v2129_v31 = vmul.f32 %v2674_v36, %v2028_v7  ;;  %v2029_v15 = vmul.f32 %v1950_v34, %v1627_v9  ;;  %v1987_v7 = vmul.f32 %v2889_v23, %v4948_v56  ;;  %v1985_v59 = vsel %vm1983_vm15, %v1984_v4, %v1982_v5 }
 0x29b   :  { %v1629_v8 = vpop.f32.mrf.mxu1 }
 0x29c   :  { %v2030_v47 = vmul.f32 %v1950_v34, %v1629_v8  ;;  %2706 = vmatprep.mubr.msk.f32.mxu0 %vm933_vm6, %v2129_v31  ;;  %v2130_v28 = vmul.f32 %v2675_v45, %v2029_v15  ;;  %v2683_v34 = vld [vmem:[%s5136_s3 + $0x2f0] sm:$0xff]  ;;  %v2686_v15 = vld [vmem:[%s5136_s3 + $0x308] sm:$0xff]  ;;  %v1989_v8 = vsel %vm1988_vm1, %v4948_v56, %v1987_v7 }
 0x29d   :  { %v1633_v54 = vpop.f32.mrf.mxu1  ;;  %2369 = vmatmul.mubr.f32.gmra.mxu0 %v2128_v51  ;;  %v2687_v56 = vld [vmem:[%s5136_s3 + $0x310] sm:$0xff] }
 0x29e   :  { %v2131_v49 = vmul.f32 %v2676_v11, %v2030_v47  ;;  %v2031_v38 = vmul.f32 %v1957_v13, %v1633_v54  ;;  %v2685_v11 = vld [vmem:[%s5136_s3 + $0x300] sm:$0xff] }
 0x29f   :  { %v1635_v61 = vpop.f32.mrf.mxu1 }
 0x2a0   :  { %v2032_v30 = vmul.f32 %v1957_v13, %v1635_v61  ;;  %2707 = vmatprep.mubr.msk.f32.mxu0 %vm933_vm6, %v2131_v49  ;;  %v2132_v6 = vmul.f32 %v2677_v42, %v2031_v38  ;;  %v1992_v13 = vsel %vm1990_vm2, %v1991_v10, %v1989_v8 }
 0x2a1   :  { %v1639_v53 = vpop.f32.mrf.mxu1  ;;  %2374 = vmatmul.mubr.f32.gmra.mxu0 %v2130_v28 }
 0x2a2   :  { %v2133_v20 = vmul.f32 %v2678_v63, %v2032_v30  ;;  %v2033_v18 = vmul.f32 %v1964_v43, %v1639_v53 }
 0x2a3   :  { %v1641_v50 = vpop.f32.mrf.mxu1 }
 0x2a4   :  { %v2034_v14 = vmul.f32 %v1964_v43, %v1641_v50  ;;  %2708 = vmatprep.mubr.msk.f32.mxu1 %vm933_vm6, %v2133_v20  ;;  %v2134_v60 = vmul.f32 %v2679_v2, %v2033_v18 }
 0x2a5   :  { %v1645_v55 = vpop.f32.mrf.mxu1  ;;  %2379 = vmatmul.mubr.f32.vlgmr.msra.gmra.mxu1 %v2132_v6 }
 0x2a6   :  { %v2135_v41 = vmul.f32 %v2680_v16, %v2034_v14  ;;  %v2035_v21 = vmul.f32 %v1971_v57, %v1645_v55 }
 0x2a7   :  { %v1647_v46 = vpop.f32.mrf.mxu1 }
 0x2a8   :  { %v2036_v62 = vmul.f32 %v1971_v57, %v1647_v46  ;;  %2709 = vmatprep.mubr.msk.f32.mxu1 %vm933_vm6, %v2135_v41  ;;  %v2136_v39 = vmul.f32 %v2681_v48, %v2035_v21 }
 0x2a9   :  { %v1651_v37 = vpop.f32.mrf.mxu1  ;;  %2384 = vmatmul.mubr.f32.gmra.mxu1 %v2134_v60 }
 0x2aa   :  { %v2137_v29 = vmul.f32 %v2682_v27, %v2036_v62  ;;  %v2037_v25 = vmul.f32 %v1978_v35, %v1651_v37 }
 0x2ab   :  { %v1653_v36 = vpop.f32.mrf.mxu1 }
 0x2ac   :  { %v2038_v9 = vmul.f32 %v1978_v35, %v1653_v36  ;;  %2710 = vmatprep.mubr.msk.f32.mxu1 %vm933_vm6, %v2137_v29  ;;  %v2138_v52 = vmul.f32 %v2683_v34, %v2037_v25 }
 0x2ad   :  { %v1657_v0 = vpop.f32.mrf.mxu1  ;;  %2389 = vmatmul.mubr.f32.gmra.mxu1 %v2136_v39 }
 0x2ae   :  { %v2139_v31 = vmul.f32 %v2684_v58, %v2038_v9  ;;  %v2039_v51 = vmul.f32 %v1985_v59, %v1657_v0 }
 0x2af   :  { %v1659_v24 = vpop.f32.mrf.mxu1 }
 0x2b0   :  { %v2040_v45 = vmul.f32 %v1985_v59, %v1659_v24  ;;  %2711 = vmatprep.mubr.msk.f32.mxu1 %vm933_vm6, %v2139_v31  ;;  %v2140_v17 = vmul.f32 %v2685_v11, %v2039_v51 }
 0x2b1   :  { %v1663_v47 = vpop.f32.mrf.mxu1  ;;  %2394 = vmatmul.mubr.f32.gmra.mxu1 %v2138_v52 }
 0x2b2   :  { %v2141_v54 = vmul.f32 %v2686_v15, %v2040_v45  ;;  %v2041_v49 = vmul.f32 %v1992_v13, %v1663_v47 }
 0x2b3   :  { %v1665_v1 = vpop.f32.mrf.mxu1 }
 0x2b4   :  { %v2042_v32 = vmul.f32 %v1992_v13, %v1665_v1  ;;  %2712 = vmatprep.mubr.msk.f32.mxu1 %vm933_vm6, %v2141_v54  ;;  %v2142_v38 = vmul.f32 %v2687_v56, %v2041_v49 }
 0x2b5   :  { %2399 = vmatmul.mubr.f32.gmra.mxu1 %v2140_v17 }
 0x2b6   :  { %v2143_v28 = vmul.f32 %v2688_v22, %v2042_v32 }
 0x2b8   :  { %2713 = vmatprep.mubr.msk.f32.mxu1 %vm933_vm6, %v2143_v28 }
 0x2b9   :  { %2404 = vmatmul.mubr.f32.gmra.mxu1 %v2142_v38 }
 0x319   :  { %v2285_v61 = vpop.f32.mrf.mxu0 }
 0x31a   :  { %2714 = vst.msk [vmem:[%s5137_s4 + $0xc8] sm:$0xff] %vm1199_vm10, %v2285_v61 }
 0x31b   :  { %v2287_v63 = vpop.f32.mrf.mxu0 }
 0x31d   :  { %v2290_v42 = vpop.f32.mrf.mxu0 }
 0x31e   :  { %2715 = vst.msk [vmem:[%s5137_s4 + $0xd0] sm:$0xff] %vm1199_vm10, %v2290_v42 }
 0x31f   :  { %v2292_v30 = vpop.f32.mrf.mxu0 }
 0x321   :  { %v2295_v53 = vpop.f32.mrf.mxu0 }
 0x322   :  { %2716 = vst.msk [vmem:[%s5137_s4 + $0xd8] sm:$0xff] %vm1199_vm10, %v2295_v53 }
 0x323   :  { %v2297_v43 = vpop.f32.mrf.mxu0 }
 0x325   :  { %v2300_v19 = vpop.f32.mrf.mxu0 }
 0x326   :  { %2717 = vst.msk [vmem:[%s5137_s4 + $0xe0] sm:$0xff] %vm1199_vm10, %v2300_v19 }
 0x327   :  { %v2302_v20 = vpop.f32.mrf.mxu0 }
 0x329   :  { %v2305_v44 = vpop.f32.mrf.mxu0 }
 0x32a   :  { %2718 = vst.msk [vmem:[%s5137_s4 + $0xe8] sm:$0xff] %vm1199_vm10, %v2305_v44 }
 0x32b   :  { %v2307_v3 = vpop.f32.mrf.mxu0 }
 0x32d   :  { %v2310_v12 = vpop.f32.mrf.mxu0 }
 0x32e   :  { %2719 = vst.msk [vmem:[%s5137_s4 + $0xf0] sm:$0xff] %vm1199_vm10, %v2310_v12 }
 0x32f   :  { %v2312_v6 = vpop.f32.mrf.mxu0 }
 0x331   :  { %v2315_v18 = vpop.f32.mrf.mxu0 }
 0x332   :  { %2720 = vst.msk [vmem:[%s5137_s4 + $0xf8] sm:$0xff] %vm1199_vm10, %v2315_v18 }
 0x333   :  { %v2317_v50 = vpop.f32.mrf.mxu0 }
 0x335   :  { %v2320_v16 = vpop.f32.mrf.mxu0 }
 0x336   :  { %2721 = vst.msk [vmem:[%s5137_s4 + $0x100] sm:$0xff] %vm1199_vm10, %v2320_v16 }
 0x337   :  { %v2322_v2 = vpop.f32.mrf.mxu0 }
 0x339   :  { %v2325_v14 = vpop.f32.mrf.mxu0 }
 0x33a   :  { %2722 = vst.msk [vmem:[%s5137_s4 + $0x108] sm:$0xff] %vm1199_vm10, %v2325_v14 }
 0x33b   :  { %v2327_v55 = vpop.f32.mrf.mxu0 }
 0x33d   :  { %v2330_v57 = vpop.f32.mrf.mxu0 }
 0x33e   :  { %2723 = vst.msk [vmem:[%s5137_s4 + $0x110] sm:$0xff] %vm1199_vm10, %v2330_v57 }
 0x33f   :  { %v2332_v41 = vpop.f32.mrf.mxu0 }
 0x341   :  { %v2335_v40 = vpop.f32.mrf.mxu0 }
 0x342   :  { %2724 = vst.msk [vmem:[%s5137_s4 + $0x118] sm:$0xff] %vm1199_vm10, %v2335_v40 }
 0x343   :  { %v2337_v33 = vpop.f32.mrf.mxu0 }
 0x345   :  { %v2340_v26 = vpop.f32.mrf.mxu0 }
 0x346   :  { %2725 = vst.msk [vmem:[%s5137_s4 + $0x120] sm:$0xff] %vm1199_vm10, %v2340_v26 }
 0x347   :  { %v2342_v60 = vpop.f32.mrf.mxu0 }
 0x349   :  { %v2345_v21 = vpop.f32.mrf.mxu0 }
 0x34a   :  { %2726 = vst.msk [vmem:[%s5137_s4 + $0x128] sm:$0xff] %vm1199_vm10, %v2345_v21 }
 0x34b   :  { %v2347_v46 = vpop.f32.mrf.mxu0 }
 0x34d   :  { %v2350_v27 = vpop.f32.mrf.mxu0 }
 0x34e   :  { %2727 = vst.msk [vmem:[%s5137_s4 + $0x130] sm:$0xff] %vm1199_vm10, %v2350_v27 }
 0x34f   :  { %v2352_v23 = vpop.f32.mrf.mxu0 }
 0x351   :  { %v2355_v48 = vpop.f32.mrf.mxu0 }
 0x352   :  { %2728 = vst.msk [vmem:[%s5137_s4 + $0x138] sm:$0xff] %vm1199_vm10, %v2355_v48 }
 0x353   :  { %v2357_v62 = vpop.f32.mrf.mxu0 }
 0x355   :  { %v2360_v37 = vpop.f32.mrf.mxu0 }
 0x356   :  { %2729 = vst.msk [vmem:[%s5137_s4 + $0x140] sm:$0xff] %vm1199_vm10, %v2360_v37 }
 0x357   :  { %v2362_v29 = vpop.f32.mrf.mxu0 }
 0x359   :  { %v2365_v35 = vpop.f32.mrf.mxu0 }
 0x35a   :  { %2730 = vst.msk [vmem:[%s5137_s4 + $0x148] sm:$0xff] %vm1199_vm10, %v2365_v35 }
 0x35b   :  { %v2367_v5 = vpop.f32.mrf.mxu0 }
 0x35d   :  { %v2370_v4 = vpop.f32.mrf.mxu0 }
 0x35e   :  { %2731 = vst.msk [vmem:[%s5137_s4 + $0x150] sm:$0xff] %vm1199_vm10, %v2370_v4 }
 0x35f   :  { %v2372_v39 = vpop.f32.mrf.mxu0 }
 0x361   :  { %v2375_v25 = vpop.f32.mrf.mxu0 }
 0x362   :  { %2732 = vst.msk [vmem:[%s5137_s4 + $0x158] sm:$0xff] %vm1199_vm10, %v2375_v25 }
 0x363   :  { %v2377_v36 = vpop.f32.mrf.mxu0 }
 0x365   :  { %v2380_v58 = vpop.f32.mrf.mxu1 }
 0x366   :  { %2733 = vst.msk [vmem:[%s5137_s4 + $0x160] sm:$0xff] %vm1199_vm10, %v2380_v58 }
 0x367   :  { %v2382_v7 = vpop.f32.mrf.mxu1 }
 0x369   :  { %v2385_v34 = vpop.f32.mrf.mxu1 }
 0x36a   :  { %2734 = vst.msk [vmem:[%s5137_s4 + $0x168] sm:$0xff] %vm1199_vm10, %v2385_v34 }
 0x36b   :  { %v2387_v9 = vpop.f32.mrf.mxu1 }
 0x36d   :  { %v2390_v0 = vpop.f32.mrf.mxu1 }
 0x36e   :  { %2735 = vst.msk [vmem:[%s5137_s4 + $0x170] sm:$0xff] %vm1199_vm10, %v2390_v0 }
 0x36f   :  { %v2392_v31 = vpop.f32.mrf.mxu1 }
 0x371   :  { %v2395_v59 = vpop.f32.mrf.mxu1 }
 0x372   :  { %2736 = vst.msk [vmem:[%s5137_s4 + $0x178] sm:$0xff] %vm1199_vm10, %v2395_v59 }
 0x373   :  { %v2397_v10 = vpop.f32.mrf.mxu1 }
 0x375   :  { %v2400_v52 = vpop.f32.mrf.mxu1 }
 0x376   :  { %2737 = vst.msk [vmem:[%s5137_s4 + $0x180] sm:$0xff] %vm1199_vm10, %v2400_v52 }
 0x377   :  { %v2402_v51 = vpop.f32.mrf.mxu1 }
 0x379   :  { %v2405_v24 = vpop.f32.mrf.mxu1 }
 0x37a   :  { %2738 = vst.msk [vmem:[%s5137_s4 + $0x188] sm:$0xff] %vm1199_vm10, %v2405_v24 }
 0x37b   :  { %v2407_v15 = vpop.f32.mrf.mxu1 }

</bundles_post_ra>
